<compile_context>
chip_gen: v6e
topology: v6e:2x2x1
jax: 0.10.0
libtpu: 0.0.40
codegen_flags: <defaults>
</compile_context>

<pallas_src>
import jax
import jax.numpy as jnp
from jax import lax
from jax.experimental import pallas as pl
from jax.experimental.pallas import tpu as pltpu


# ----------------------------------------------------------------------------
# Per-generation VMEM budget (v7x: 64 MiB physical -> ~48 MiB; v5e/v6e: 128 MiB
# physical -> ~100 MiB).  Falls back safely if the query is unavailable.
# ----------------------------------------------------------------------------
_VMEM_LIMIT = None


def _vmem_limit_bytes():
    global _VMEM_LIMIT
    if _VMEM_LIMIT is None:
        cap = 128 * 1024 * 1024
        try:
            cap = int(pltpu.get_tpu_info().vmem_capacity_bytes)
        except Exception:
            pass
        _VMEM_LIMIT = int(min(cap - 16 * 1024 * 1024, 100 * 1024 * 1024))
    return _VMEM_LIMIT


# ----------------------------------------------------------------------------
# Fused Bottleneck kernel: one full image per grid step.
# ----------------------------------------------------------------------------
def _bottleneck_kernel(x_ref, w1_ref, b1_ref, w2_ref, b2_ref, w3_ref, b3_ref,
                       o_ref):
    # x_ref : (1, H, W, Cin) bf16        (whole image, auto-pipelined)
    # w1    : (Cin, P)  bf16             b1 : (1, P)  f32
    # w2    : (9P, P)   bf16             b2 : (1, P)  f32   (K = (ky*3+kx)*P+i)
    # w3    : (P, C4)   bf16             b3 : (1, C4) f32
    # o_ref : (1, H, W, C4) bf16
    _, H, W, Cin = x_ref.shape
    P = w1_ref.shape[1]
    C4 = w3_ref.shape[1]

    xm = x_ref[...].reshape(H * W, Cin)                      # bf16

    # conv1 (1x1, BN scale folded) + bias + ReLU. f32 MXU acc, f32 epilogue.
    y1 = jnp.dot(xm, w1_ref[...], preferred_element_type=jnp.float32)
    y1 = jnp.maximum(y1 + b1_ref[...], 0.0)
    y1 = y1.astype(jnp.bfloat16).reshape(H, W, P)

    # Zero-pad H and W by 1 (conv2 padding=1).  Never touches HBM.
    zc = jnp.zeros((H, 1, P), jnp.bfloat16)
    zr = jnp.zeros((1, W + 2, P), jnp.bfloat16)
    yp = jnp.concatenate([zr, jnp.concatenate([zc, y1, zc], axis=1), zr],
                         axis=0)                             # (H+2, W+2, P)

    # conv2 (3x3, BN scale folded): single MXU matmul with K = 9P.  Taps are
    # sliced from P-wide data before the lane concat; (ky, kx, i) ordering
    # matches w2_ref's K layout.
    taps = [yp[dy:dy + H, dx:dx + W, :]
            for dy in range(3) for dx in range(3)]           # 9 x (H, W, P)
    lhs = jnp.concatenate(taps, axis=-1).reshape(H * W, 9 * P)
    y2 = jnp.dot(lhs, w2_ref[...], preferred_element_type=jnp.float32)
    y2 = jnp.maximum(y2 + b2_ref[...], 0.0).astype(jnp.bfloat16)

    # conv3 (1x1, BN scale folded) + bias + residual + ReLU; f32 epilogue,
    # cast to bf16 only at the store (halves HBM writeback).
    y3 = jnp.dot(y2, w3_ref[...], preferred_element_type=jnp.float32) + b3_ref[...]
    out = jnp.maximum(y3 + xm.astype(jnp.float32), 0.0)      # Cin == C4 residual
    o_ref[...] = out.astype(o_ref.dtype).reshape(1, H, W, C4)


def _fused_call(x_nhwc, w1, b1, w2, b2, w3, b3):
    N, H, W, Cin = x_nhwc.shape
    P = w1.shape[1]
    C4 = w3.shape[1]

    flops = 2 * N * H * W * P * (Cin + 9 * P + C4)
    bytes_accessed = (N * H * W * Cin * 2 + N * H * W * C4 * 2
                      + (w1.size + w2.size + w3.size) * 2
                      + (b1.size + b2.size + b3.size) * 4)

    return pl.pallas_call(
        _bottleneck_kernel,
        out_shape=jax.ShapeDtypeStruct((N, H, W, C4), jnp.bfloat16),
        grid=(N,),
        in_specs=[
            pl.BlockSpec((1, H, W, Cin), lambda n: (n, 0, 0, 0)),   # x image
            pl.BlockSpec((Cin, P), lambda n: (0, 0)),
            pl.BlockSpec((1, P), lambda n: (0, 0)),
            pl.BlockSpec((9 * P, P), lambda n: (0, 0)),
            pl.BlockSpec((1, P), lambda n: (0, 0)),
            pl.BlockSpec((P, C4), lambda n: (0, 0)),
            pl.BlockSpec((1, C4), lambda n: (0, 0)),
        ],
        out_specs=pl.BlockSpec((1, H, W, C4), lambda n: (n, 0, 0, 0)),
        compiler_params=pltpu.CompilerParams(
            dimension_semantics=("parallel",),       # batch -> megacore on v7x
            vmem_limit_bytes=_vmem_limit_bytes(),
        ),
        cost_estimate=pl.CostEstimate(
            flops=flops, transcendentals=0, bytes_accessed=bytes_accessed),
    )(x_nhwc, w1, b1, w2, b2, w3, b3)


@jax.jit
def bottleneck_forward_nhwc(x_nhwc_bf16, w1, b1, w2, b2, w3, b3):
    """Preferred entry point: NHWC bf16 in, NHWC bf16 out (no transposes)."""
    return _fused_call(x_nhwc_bf16, w1, b1, w2, b2, w3, b3)


@jax.jit
def bottleneck_forward(x_nchw, w1, b1, w2, b2, w3, b3):
    """PyTorch-compatible NCHW f32 interface (eval BN, stride=1, no downsample).

    In a full network keep activations NHWC bf16 end-to-end and call
    `bottleneck_forward_nhwc`; the transposes below are HBM round trips that
    cost more than the fused kernel at real ResNet sizes.
    """
    N, Cin, H, W = x_nchw.shape
    C4 = w3.shape[1]
    assert Cin == C4, "residual path requires inplanes == 4*planes (downsample=None)"
    x_nhwc = jnp.transpose(x_nchw, (0, 2, 3, 1)).astype(jnp.bfloat16)
    out_nhwc = _fused_call(x_nhwc, w1, b1, w2, b2, w3, b3)
    return jnp.transpose(out_nhwc, (0, 3, 1, 2))


# ----------------------------------------------------------------------------
# Parameter preparation (exact eval-mode BN folding into conv weights).
# ----------------------------------------------------------------------------
def fold_bn_eval(gamma, beta, mean, var, eps=1e-5):
    scale = gamma / jnp.sqrt(var + eps)
    return scale, beta - mean * scale


def prepare_params(raw):
    """PyTorch-layout weights + BN stats -> kernel operands (bf16 W, f32 bias)."""
    s1, b1 = fold_bn_eval(raw["bn1_g"], raw["bn1_b"], raw["bn1_m"], raw["bn1_v"])
    s2, b2 = fold_bn_eval(raw["bn2_g"], raw["bn2_b"], raw["bn2_m"], raw["bn2_v"])
    s3, b3 = fold_bn_eval(raw["bn3_g"], raw["bn3_b"], raw["bn3_m"], raw["bn3_v"])
    P = raw["conv1_w"].shape[0]
    f32 = jnp.float32
    w1 = (raw["conv1_w"][:, :, 0, 0].T * s1[None, :]).astype(jnp.bfloat16)   # (Cin, P)
    w2 = jnp.transpose(raw["conv2_w"], (2, 3, 1, 0)) * s2                    # (ky,kx,i,o)
    w2cat = w2.reshape(9 * P, P).astype(jnp.bfloat16)                        # K=(ky*3+kx)*P+i
    w3 = (raw["conv3_w"][:, :, 0, 0].T * s3[None, :]).astype(jnp.bfloat16)   # (P, 4P)
    return (w1, b1.reshape(1, -1).astype(f32),
            w2cat, b2.reshape(1, -1).astype(f32),
            w3, b3.reshape(1, -1).astype(f32))


# ----------------------------------------------------------------------------
# Unfused reference (lax convs).  compute_dtype=f32 == exact PyTorch eval
# semantics; compute_dtype=bf16 mirrors the kernel's bf16 boundary casts
# (including the final bf16 store).
# ----------------------------------------------------------------------------
def ref_forward(x_nchw, raw, compute_dtype):
    s1, b1 = fold_bn_eval(raw["bn1_g"], raw["bn1_b"], raw["bn1_m"], raw["bn1_v"])
    s2, b2 = fold_bn_eval(raw["bn2_g"], raw["bn2_b"], raw["bn2_m"], raw["bn2_v"])
    s3, b3 = fold_bn_eval(raw["bn3_g"], raw["bn3_b"], raw["bn3_m"], raw["bn3_v"])
    dn = ("NHWC", "HWIO", "NHWC")
    x = jnp.transpose(x_nchw, (0, 2, 3, 1)).astype(compute_dtype)
    w1 = (jnp.transpose(raw["conv1_w"], (2, 3, 1, 0)) * s1).astype(compute_dtype)
    w2 = (jnp.transpose(raw["conv2_w"], (2, 3, 1, 0)) * s2).astype(compute_dtype)
    w3 = (jnp.transpose(raw["conv3_w"], (2, 3, 1, 0)) * s3).astype(compute_dtype)
    y = lax.conv_general_dilated(x, w1, (1, 1), "VALID", dimension_numbers=dn,
                                 preferred_element_type=jnp.float32)
    y = jnp.maximum(y + b1, 0.0).astype(compute_dtype)
    y = lax.conv_general_dilated(y, w2, (1, 1), ((1, 1), (1, 1)),
                                 dimension_numbers=dn,
                                 preferred_element_type=jnp.float32)
    y = jnp.maximum(y + b2, 0.0).astype(compute_dtype)
    y = lax.conv_general_dilated(y, w3, (1, 1), "VALID", dimension_numbers=dn,
                                 preferred_element_type=jnp.float32)
    y = jnp.maximum(y + b3 + x.astype(jnp.float32), 0.0)
    if compute_dtype == jnp.bfloat16:
        y = y.astype(jnp.bfloat16)                # mirror the kernel's bf16 store
    return jnp.transpose(y, (0, 3, 1, 2)).astype(jnp.float32)


def _make_raw_params(key, inplanes, planes):
    c4 = 4 * planes
    ks = jax.random.split(key, 6)
    f32 = jnp.float32

    def bn(k, c):
        kg, kb, km, kv = jax.random.split(k, 4)
        return dict(g=1.0 + 0.1 * jax.random.normal(kg, (c,), f32),
                    b=0.1 * jax.random.normal(kb, (c,), f32),
                    m=0.1 * jax.random.normal(km, (c,), f32),
                    v=jax.nn.softplus(jax.random.normal(kv, (c,), f32)) + 0.5)

    bn1, bn2, bn3 = bn(ks[3], planes), bn(ks[4], planes), bn(ks[5], c4)
    return {
        "conv1_w": 0.1 * jax.random.normal(ks[0], (planes, inplanes, 1, 1), f32),
        "conv2_w": 0.1 * jax.random.normal(ks[1], (planes, planes, 3, 3), f32),
        "conv3_w": 0.1 * jax.random.normal(ks[2], (c4, planes, 1, 1), f32),
        "bn1_g": bn1["g"], "bn1_b": bn1["b"], "bn1_m": bn1["m"], "bn1_v": bn1["v"],
        "bn2_g": bn2["g"], "bn2_b": bn2["b"], "bn2_m": bn2["m"], "bn2_v": bn2["v"],
        "bn3_g": bn3["g"], "bn3_b": bn3["b"], "bn3_m": bn3["m"], "bn3_v": bn3["v"],
    }


if __name__ == "__main__":
    key = jax.random.PRNGKey(0)
    planes = 8
    inplanes = 4 * planes            # residual valid with downsample=None
    c4 = 4 * planes

    raw = _make_raw_params(jax.random.fold_in(key, 1), inplanes, planes)
    kparams = prepare_params(raw)

    # Case 0: 2 x 32 x 16 x 16 (batch axis exercises megacore-safe grid).
    # Case 1: 1 x 32 x 24 x 16 (H not a multiple of 16, single image).
    for case, (N, H, W) in enumerate([(2, 16, 16), (1, 24, 16)]):
        x = jax.random.normal(jax.random.fold_in(key, 2 + case),
                              (N, inplanes, H, W), jnp.float32)
        out = bottleneck_forward(x, *kparams)
        out = jax.block_until_ready(out)
        assert out.shape == (N, c4, H, W), out.shape
        out_f32 = out.astype(jnp.float32)

        # Tight check vs an unfused reference mirroring the bf16 boundary casts.
        ref_bf16 = ref_forward(x, raw, jnp.bfloat16)
        err = float(jnp.max(jnp.abs(out_f32 - ref_bf16)))
        assert err < 8e-2, f"case {case}: max |diff| vs bf16 reference = {err}"

        # Loose check vs exact f32 (PyTorch eval) semantics.
        ref_f32 = ref_forward(x, raw, jnp.float32)
        err32 = float(jnp.max(jnp.abs(out_f32 - ref_f32)))
        assert err32 < 0.2, f"case {case}: max |diff| vs f32 reference = {err32}"

    print("KERNEL_OK")
</pallas_src>

<mosaic_0001>
module attributes {stable_mosaic.version = 11 : i64} {
  func.func @_bottleneck_kernel(%arg0: i32, %arg1: memref<1x16x16x32xbf16, #tpu.memory_space<vmem>>, %arg2: memref<32x8xbf16, #tpu.memory_space<vmem>>, %arg3: memref<1x8xf32, #tpu.memory_space<vmem>>, %arg4: memref<72x8xbf16, #tpu.memory_space<vmem>>, %arg5: memref<1x8xf32, #tpu.memory_space<vmem>>, %arg6: memref<8x32xbf16, #tpu.memory_space<vmem>>, %arg7: memref<1x32xf32, #tpu.memory_space<vmem>>, %arg8: memref<1x16x16x32xbf16, #tpu.memory_space<vmem>>) attributes {dimension_semantics = [#tpu.dimension_semantics<parallel>], iteration_bounds = array<i64: 2>, scalar_prefetch = 0 : i64, scratch_operands = 0 : i64, tpu.core_type = #tpu.core_type<tc>, window_params = [{transform_indices = @transform_0, window_bounds = array<i64: 1, 16, 16, 32>}, {pipeline_mode = #tpu.pipeline_mode<synchronous>, transform_indices = @transform_1, window_bounds = array<i64: 32, 8>}, {pipeline_mode = #tpu.pipeline_mode<synchronous>, transform_indices = @transform_2, window_bounds = array<i64: 1, 8>}, {pipeline_mode = #tpu.pipeline_mode<synchronous>, transform_indices = @transform_3, window_bounds = array<i64: 72, 8>}, {pipeline_mode = #tpu.pipeline_mode<synchronous>, transform_indices = @transform_4, window_bounds = array<i64: 1, 8>}, {pipeline_mode = #tpu.pipeline_mode<synchronous>, transform_indices = @transform_5, window_bounds = array<i64: 8, 32>}, {pipeline_mode = #tpu.pipeline_mode<synchronous>, transform_indices = @transform_6, window_bounds = array<i64: 1, 32>}, {transform_indices = @transform_7, window_bounds = array<i64: 1, 16, 16, 32>}]} {
    %c0 = arith.constant 0 : index
    %c0_0 = arith.constant 0 : index
    %c0_1 = arith.constant 0 : index
    %c0_2 = arith.constant 0 : index
    %0 = vector.load %arg1[%c0, %c0_0, %c0_1, %c0_2] : memref<1x16x16x32xbf16, #tpu.memory_space<vmem>>, vector<1x16x16x32xbf16>
    %1 = vector.shape_cast %0 : vector<1x16x16x32xbf16> to vector<256x32xbf16>
    %c0_3 = arith.constant 0 : index
    %c0_4 = arith.constant 0 : index
    %2 = vector.load %arg2[%c0_3, %c0_4] : memref<32x8xbf16, #tpu.memory_space<vmem>>, vector<32x8xbf16>
    %cst = arith.constant dense<0.000000e+00> : vector<256x8xf32>
    %3 = tpu.matmul %1, %2, %cst {dimension_numbers = #tpu.dot_dimension_numbers<[1], [0], [0], [1], [0, 0, 1, 1], [], []>} : vector<256x32xbf16>, vector<32x8xbf16>, vector<256x8xf32> -> vector<256x8xf32>
    %c0_5 = arith.constant 0 : index
    %c0_6 = arith.constant 0 : index
    %4 = vector.load %arg3[%c0_5, %c0_6] : memref<1x8xf32, #tpu.memory_space<vmem>>, vector<1x8xf32>
    %5 = vector.broadcast %4 : vector<1x8xf32> to vector<256x8xf32>
    %6 = arith.addf %3, %5 : vector<256x8xf32>
    %cst_7 = arith.constant 0.000000e+00 : f32
    %7 = vector.broadcast %cst_7 : f32 to vector<256x8xf32>
    %8 = arith.maximumf %6, %7 : vector<256x8xf32>
    %9 = arith.truncf %8 : vector<256x8xf32> to vector<256x8xbf16>
    %10 = vector.shape_cast %9 : vector<256x8xbf16> to vector<16x16x8xbf16>
    %cst_8 = arith.constant 0.000000e+00 : bf16
    %11 = vector.broadcast %cst_8 : bf16 to vector<16x1x8xbf16>
    %cst_9 = arith.constant 0.000000e+00 : bf16
    %12 = vector.broadcast %cst_9 : bf16 to vector<1x18x8xbf16>
    %13 = tpu.concatenate %11, %10, %11 in 1 : vector<16x1x8xbf16>, vector<16x16x8xbf16>, vector<16x1x8xbf16> -> vector<16x18x8xbf16>
    %14 = tpu.concatenate %12, %13, %12 in 0 : vector<1x18x8xbf16>, vector<16x18x8xbf16>, vector<1x18x8xbf16> -> vector<18x18x8xbf16>
    %15 = vector.extract_strided_slice %14 {offsets = [0, 0, 0], sizes = [16, 16, 8], strides = [1, 1, 1]} : vector<18x18x8xbf16> to vector<16x16x8xbf16>
    %16 = vector.extract_strided_slice %14 {offsets = [0, 1, 0], sizes = [16, 16, 8], strides = [1, 1, 1]} : vector<18x18x8xbf16> to vector<16x16x8xbf16>
    %17 = vector.extract_strided_slice %14 {offsets = [0, 2, 0], sizes = [16, 16, 8], strides = [1, 1, 1]} : vector<18x18x8xbf16> to vector<16x16x8xbf16>
    %18 = vector.extract_strided_slice %14 {offsets = [1, 0, 0], sizes = [16, 16, 8], strides = [1, 1, 1]} : vector<18x18x8xbf16> to vector<16x16x8xbf16>
    %19 = vector.extract_strided_slice %14 {offsets = [1, 1, 0], sizes = [16, 16, 8], strides = [1, 1, 1]} : vector<18x18x8xbf16> to vector<16x16x8xbf16>
    %20 = vector.extract_strided_slice %14 {offsets = [1, 2, 0], sizes = [16, 16, 8], strides = [1, 1, 1]} : vector<18x18x8xbf16> to vector<16x16x8xbf16>
    %21 = vector.extract_strided_slice %14 {offsets = [2, 0, 0], sizes = [16, 16, 8], strides = [1, 1, 1]} : vector<18x18x8xbf16> to vector<16x16x8xbf16>
    %22 = vector.extract_strided_slice %14 {offsets = [2, 1, 0], sizes = [16, 16, 8], strides = [1, 1, 1]} : vector<18x18x8xbf16> to vector<16x16x8xbf16>
    %23 = vector.extract_strided_slice %14 {offsets = [2, 2, 0], sizes = [16, 16, 8], strides = [1, 1, 1]} : vector<18x18x8xbf16> to vector<16x16x8xbf16>
    %24 = tpu.concatenate %15, %16, %17, %18, %19, %20, %21, %22, %23 in 2 : vector<16x16x8xbf16>, vector<16x16x8xbf16>, vector<16x16x8xbf16>, vector<16x16x8xbf16>, vector<16x16x8xbf16>, vector<16x16x8xbf16>, vector<16x16x8xbf16>, vector<16x16x8xbf16>, vector<16x16x8xbf16> -> vector<16x16x72xbf16>
    %25 = vector.shape_cast %24 : vector<16x16x72xbf16> to vector<256x72xbf16>
    %c0_10 = arith.constant 0 : index
    %c0_11 = arith.constant 0 : index
    %26 = vector.load %arg4[%c0_10, %c0_11] : memref<72x8xbf16, #tpu.memory_space<vmem>>, vector<72x8xbf16>
    %cst_12 = arith.constant dense<0.000000e+00> : vector<256x8xf32>
    %27 = tpu.matmul %25, %26, %cst_12 {dimension_numbers = #tpu.dot_dimension_numbers<[1], [0], [0], [1], [0, 0, 1, 1], [], []>} : vector<256x72xbf16>, vector<72x8xbf16>, vector<256x8xf32> -> vector<256x8xf32>
    %c0_13 = arith.constant 0 : index
    %c0_14 = arith.constant 0 : index
    %28 = vector.load %arg5[%c0_13, %c0_14] : memref<1x8xf32, #tpu.memory_space<vmem>>, vector<1x8xf32>
    %29 = vector.broadcast %28 : vector<1x8xf32> to vector<256x8xf32>
    %30 = arith.addf %27, %29 : vector<256x8xf32>
    %cst_15 = arith.constant 0.000000e+00 : f32
    %31 = vector.broadcast %cst_15 : f32 to vector<256x8xf32>
    %32 = arith.maximumf %30, %31 : vector<256x8xf32>
    %33 = arith.truncf %32 : vector<256x8xf32> to vector<256x8xbf16>
    %c0_16 = arith.constant 0 : index
    %c0_17 = arith.constant 0 : index
    %34 = vector.load %arg6[%c0_16, %c0_17] : memref<8x32xbf16, #tpu.memory_space<vmem>>, vector<8x32xbf16>
    %cst_18 = arith.constant dense<0.000000e+00> : vector<256x32xf32>
    %35 = tpu.matmul %33, %34, %cst_18 {dimension_numbers = #tpu.dot_dimension_numbers<[1], [0], [0], [1], [0, 0, 1, 1], [], []>} : vector<256x8xbf16>, vector<8x32xbf16>, vector<256x32xf32> -> vector<256x32xf32>
    %c0_19 = arith.constant 0 : index
    %c0_20 = arith.constant 0 : index
    %36 = vector.load %arg7[%c0_19, %c0_20] : memref<1x32xf32, #tpu.memory_space<vmem>>, vector<1x32xf32>
    %37 = vector.broadcast %36 : vector<1x32xf32> to vector<256x32xf32>
    %38 = arith.addf %35, %37 : vector<256x32xf32>
    %39 = arith.extf %1 : vector<256x32xbf16> to vector<256x32xf32>
    %40 = arith.addf %38, %39 : vector<256x32xf32>
    %cst_21 = arith.constant 0.000000e+00 : f32
    %41 = vector.broadcast %cst_21 : f32 to vector<256x32xf32>
    %42 = arith.maximumf %40, %41 : vector<256x32xf32>
    %43 = arith.truncf %42 : vector<256x32xf32> to vector<256x32xbf16>
    %44 = vector.shape_cast %43 : vector<256x32xbf16> to vector<1x16x16x32xbf16>
    %c0_22 = arith.constant 0 : index
    %c0_23 = arith.constant 0 : index
    %c0_24 = arith.constant 0 : index
    %c0_25 = arith.constant 0 : index
    %45 = vector.load %arg8[%c0_22, %c0_23, %c0_24, %c0_25] : memref<1x16x16x32xbf16, #tpu.memory_space<vmem>>, vector<1x16x16x32xbf16>
    tpu.vector_store %arg8[%c0_22, %c0_23, %c0_24, %c0_25], %44 {strides = array<i32>} : memref<1x16x16x32xbf16, #tpu.memory_space<vmem>>, vector<1x16x16x32xbf16>,
    return
  }
  func.func @transform_0(%arg0: i32) -> (i32, i32, i32, i32) {
    %c0_i32 = arith.constant 0 : i32
    %c0_i32_0 = arith.constant 0 : i32
    %c0_i32_1 = arith.constant 0 : i32
    %c0_i32_2 = arith.constant 0 : i32
    return %arg0, %c0_i32, %c0_i32_0, %c0_i32_1 : i32, i32, i32, i32
  }
  func.func @transform_1(%arg0: i32) -> (i32, i32) {
    %c0_i32 = arith.constant 0 : i32
    %c0_i32_0 = arith.constant 0 : i32
    %c0_i32_1 = arith.constant 0 : i32
    return %c0_i32, %c0_i32_0 : i32, i32
  }
  func.func @transform_2(%arg0: i32) -> (i32, i32) {
    %c0_i32 = arith.constant 0 : i32
    %c0_i32_0 = arith.constant 0 : i32
    %c0_i32_1 = arith.constant 0 : i32
    return %c0_i32, %c0_i32_0 : i32, i32
  }
  func.func @transform_3(%arg0: i32) -> (i32, i32) {
    %c0_i32 = arith.constant 0 : i32
    %c0_i32_0 = arith.constant 0 : i32
    %c0_i32_1 = arith.constant 0 : i32
    return %c0_i32, %c0_i32_0 : i32, i32
  }
  func.func @transform_4(%arg0: i32) -> (i32, i32) {
    %c0_i32 = arith.constant 0 : i32
    %c0_i32_0 = arith.constant 0 : i32
    %c0_i32_1 = arith.constant 0 : i32
    return %c0_i32, %c0_i32_0 : i32, i32
  }
  func.func @transform_5(%arg0: i32) -> (i32, i32) {
    %c0_i32 = arith.constant 0 : i32
    %c0_i32_0 = arith.constant 0 : i32
    %c0_i32_1 = arith.constant 0 : i32
    return %c0_i32, %c0_i32_0 : i32, i32
  }
  func.func @transform_6(%arg0: i32) -> (i32, i32) {
    %c0_i32 = arith.constant 0 : i32
    %c0_i32_0 = arith.constant 0 : i32
    %c0_i32_1 = arith.constant 0 : i32
    return %c0_i32, %c0_i32_0 : i32, i32
  }
  func.func @transform_7(%arg0: i32) -> (i32, i32, i32, i32) {
    %c0_i32 = arith.constant 0 : i32
    %c0_i32_0 = arith.constant 0 : i32
    %c0_i32_1 = arith.constant 0 : i32
    %c0_i32_2 = arith.constant 0 : i32
    return %arg0, %c0_i32, %c0_i32_0, %c0_i32_1 : i32, i32, i32, i32
  }
}

</mosaic_0001>

<bundles_post_ra>
// kernel: bottleneck_forward.1
= control target key start
LH: loop header
LB: loop body
LE: loop exit
PB: predicated region body
PF: predicated region fallthrough
CT: control target
= control target key end

     0   :  { %12 = vsyncpa [#allocation3], 0  ;;  %s4200_s0 = inlined_call_operand.vmem [shape: bf16[2,16,16,32], index: 0, kind: input, shape index: {}]   ;;  %s4201_s1 = inlined_call_operand.vmem [shape: bf16[32,8], index: 1, kind: input, shape index: {}]   ;;  %s4202_s2 = inlined_call_operand.vmem [shape: f32[1,8], index: 2, kind: input, shape index: {}]   ;;  %s4203_s3 = inlined_call_operand.vmem [shape: bf16[72,8], index: 3, kind: input, shape index: {}]   ;;  %s4204_s4 = inlined_call_operand.vmem [shape: f32[1,8], index: 4, kind: input, shape index: {}]   ;;  %s4205_s5 = inlined_call_operand.vmem [shape: bf16[8,32], index: 5, kind: input, shape index: {}]   ;;  %s4206_s6 = inlined_call_operand.vmem [shape: f32[1,32], index: 6, kind: input, shape index: {}]   ;;  %s4207_s7 = inlined_call_operand.hbm [shape: bf16[2,16,16,32], index: 7, kind: output, shape index: {}]  }
   0x1   :  { %14 = vsyncpa [#allocation3 + $0x1], 0  ;;  %s3039_s24 = smov 0   ;;  %s3041_s25 = smov 0  }
   0x2   :  { %s3043_s26 = smov 0   ;;  %s3045_s27 = smov 0  }
   0x3 LB: > { %s3060_s28 = sadd.s32 4294967295, %s2986_s27   ;;  %s2496_s29 = sadd.s32 4294967294, %s2986_s27   ;;  %s2986_s27 = sphi %s3045_s27, %s4230_s27   ;;  %s2982_s26 = sphi %s3043_s26, %s4229_s26   ;;  %s2978_s25 = sphi %s3041_s25, %s4228_s25   ;;  %s2974_s24 = sphi %s3039_s24, %s4227_s24  }
   0x4   : > { %s3064_s30 = sadd.s32 1, %s2986_s27   ;;  %s179_s8 = sadd.s32 1, %s2982_s26 }
   0x5   : > { %s176_s9 = ssub.s32 %s2986_s27, %s3064_s30  ;;  %p189_p0 = scmp.ne.s32.totalorder %s2982_s26, %s2978_s25 }
   0x6   : > { %p177_p1 = scmp.eq.s32.totalorder %s176_s9, 0  ;;  %p190_p2 = scmp.eq.s32.totalorder %s3060_s28, 1 }
   0x7   : > { %p195_p3 = scmp.ne.s32.totalorder %s2978_s25, %s2974_s24  ;;  %p196_p4 = scmp.eq.s32.totalorder %s2496_s29, 1 }
   0x8   : > { %s3075_s10 = scalar_select %p177_p1, %s2982_s26, %s179_s8  }
   0x9   : > { %p3077_p5 = por %p190_p2, %p189_p0  ;;  %p3081_p6 = por %p196_p4, %p195_p3 }
   0xa   : > { %p2499_p7 = scmp.ge.s32.totalorder %s2986_s27, 1  ;;  %p240_p8 = scmp.lt.s32.totalorder %s2986_s27, 3 }
   0xc   : > { %p241_p9 = pnand %p2499_p7, %p240_p8 }
   0xe   : > { %244 = sbr.rel (%p241_p9) target bundleno = 1030 (0x406), region = 48 }
  0x13   : > { %v2871_v0 = vld [vmem:[%s4201_s1 + $0x8] sm:$0xff]   ;;  %p272_p10 = scmp.lt.s32.totalorder %s3060_s28, 1  ;;  %v2872_v1 = vld [vmem:[%s4201_s1] sm:$0xff]   ;;  %vm413_vm0 = vcmask 261120   ;;  %v4208_v18 = vmov 0   ;;  %s2989_s22 = smov 16  }
  0x14   : > { %2704 = vmatprep.subr.bf16.mxu0 %v2871_v0  ;;  %2816 = vmatprep.subr.bf16.mxu1 %v2871_v0  ;;  %v3133_v19 = vrot.slane %v4208_v18, 1  ;;  %s2990_s23 = smov 8   ;;  %v3142_v20 = vld [vmem:[%s4202_s2] ss:$0 sm:$0xff]  ;;  %vm815_vm1 = vcmask 1040384   ;;  %s2991_s9 = smov 48  }
  0x15   : > { %s273_s17 = scalar_select %p272_p10, %s3060_s28, 1  ;;  %2705 = vmatpush3.bf16.msra.mxu0 %v2871_v0  ;;  %2818 = vmatpush3.bf16.msra.mxu1 %v2871_v0  ;;  %vm816_vm2 = vsmask.f32 256  ;;  %vm1102_vm4 = vcmask 1046528   ;;  %vm850_vm5 = vsmask.f32 7424 }
  0x16   : > { %2706 = vmatprep.subr.bf16.mxu0 %v2872_v1  ;;  %2817 = vmatprep.subr.bf16.mxu1 %v2872_v1  ;;  %vm3152_vm3 = vmand %vm815_vm1, %vm816_vm2  ;;  %s2992_s13 = smov 24   ;;  %s2993_s14 = smov 40   ;;  %vm1730_vm6 = vcmask 1043456   ;;  %vm1391_vm7 = vcmask 64512   ;;  %vm1424_vm8 = vcmask 130048   ;;  %vm1457_vm9 = vcmask 195584  }
  0x17   : > { %s2614_s18 = sshll.u32 %s273_s17, 7  ;;  %1150 = vrot.lane.b32.xlu1 %v3133_v19, %s2989_s22  ;;  %1039 = vrot.lane.b32.xlu0 %v3133_v19, %s2990_s23  ;;  %s2994_s15 = smov 64   ;;  %vm1522_vm10 = vcmask 326656   ;;  %vm1555_vm11 = vcmask 392192   ;;  %vm1588_vm12 = vcmask 457728   ;;  %vm1621_vm13 = vcmask 523264  }
  0x18   : > { %s3098_s21 = scalar_lea.vmem %s4200_s0, %s2614_s18  ;;  %s2995_s16 = smov 32   ;;  %vm1697_vm14 = vcmask 588800   ;;  %vm2387_vm15 = vcmask 257024  }
  0x19   : > { %v278_v2 = vld [vmem:[%s3098_s21] sm:$0xff]   ;;  %v280_v4 = vld [vmem:[%s3098_s21 + $0x8] sm:$0xff]   ;;  %2707 = vmatpush3.bf16.msra.mxu0 %v2872_v1  ;;  %2819 = vmatpush3.bf16.msra.mxu1 %v2872_v1  ;;  %v282_v6 = vld [vmem:[%s3098_s21 + $0x10] sm:$0xff]   ;;  %s2996_s17 = smov 56  }
  0x1a   : > { %v294_v3 = vld [vmem:[%s3098_s21 + $0x40] sm:$0xff]   ;;  %v296_v5 = vld [vmem:[%s3098_s21 + $0x48] sm:$0xff]   ;;  %v298_v7 = vld [vmem:[%s3098_s21 + $0x50] sm:$0xff]   ;;  %2708 = vmatprep.mubr.msk.bf16.mxu0 %vm413_vm0, %v278_v2 }
  0x1b   : > { %2724 = vmatprep.mubr.msk.bf16.mxu1 %vm413_vm0, %v294_v3  ;;  %v284_v8 = vld [vmem:[%s3098_s21 + $0x18] sm:$0xff]   ;;  %v286_v10 = vld [vmem:[%s3098_s21 + $0x20] sm:$0xff]   ;;  %v288_v12 = vld [vmem:[%s3098_s21 + $0x28] sm:$0xff]  }
  0x1c   : > { %2709 = vmatmul.mubr.msk.bf16.vlgmr.msra.gmra.mxu0 %vm413_vm0, %v280_v4  ;;  %2725 = vmatmul.mubr.msk.bf16.vlgmr.msra.gmra.mxu1 %vm413_vm0, %v296_v5  ;;  %v300_v9 = vld [vmem:[%s3098_s21 + $0x58] sm:$0xff]   ;;  %v302_v11 = vld [vmem:[%s3098_s21 + $0x60] sm:$0xff]   ;;  %v304_v13 = vld [vmem:[%s3098_s21 + $0x68] sm:$0xff]  }
  0x1d   : > { %2712 = vmatprep.mubr.msk.bf16.mxu0 %vm413_vm0, %v282_v6  ;;  %2728 = vmatprep.mubr.msk.bf16.mxu1 %vm413_vm0, %v298_v7  ;;  %v290_v14 = vld [vmem:[%s3098_s21 + $0x30] sm:$0xff]   ;;  %v292_v16 = vld [vmem:[%s3098_s21 + $0x38] sm:$0xff]  }
  0x1e   : > { %v306_v15 = vld [vmem:[%s3098_s21 + $0x70] sm:$0xff]   ;;  %v308_v17 = vld [vmem:[%s3098_s21 + $0x78] sm:$0xff]  }
  0x24   : > { %2713 = vmatmul.mubr.msk.bf16.gmra.mxu0 %vm413_vm0, %v284_v8  ;;  %2729 = vmatmul.mubr.msk.bf16.gmra.mxu1 %vm413_vm0, %v300_v9 }
  0x25   : > { %2716 = vmatprep.mubr.msk.bf16.mxu0 %vm413_vm0, %v286_v10  ;;  %2732 = vmatprep.mubr.msk.bf16.mxu1 %vm413_vm0, %v302_v11 }
  0x2c   : > { %2717 = vmatmul.mubr.msk.bf16.gmra.mxu0 %vm413_vm0, %v288_v12  ;;  %2733 = vmatmul.mubr.msk.bf16.gmra.mxu1 %vm413_vm0, %v304_v13 }
  0x2d   : > { %2720 = vmatprep.mubr.msk.bf16.mxu0 %vm413_vm0, %v290_v14  ;;  %2736 = vmatprep.mubr.msk.bf16.mxu1 %vm413_vm0, %v306_v15 }
  0x34   : > { %2721 = vmatmul.mubr.msk.bf16.gmra.mxu0 %vm413_vm0, %v292_v16  ;;  %2737 = vmatmul.mubr.msk.bf16.gmra.mxu1 %vm413_vm0, %v308_v17 }
  0xdc   : > { %v2710_v21 = vpop.f32.mrf.mxu0  ;;  %v2726_v22 = vpop.f32.mrf.mxu1 }
  0xdd   : > { %v569_v23 = vadd.f32 %v2726_v22, %v3142_v20  ;;  %v505_v24 = vadd.f32 %v2710_v21, %v3142_v20 }
  0xde   : > { %v496_v25 = vpop.f32.mrf.mxu0  ;;  %v560_v26 = vpop.f32.mrf.mxu1 }
  0xdf   : > { %v641_v29 = vmax.f32 %v569_v23, 0.0  ;;  %v625_v32 = vmax.f32 %v505_v24, 0.0  ;;  %v497_v33 = vadd.f32 %v3142_v20, %v496_v25  ;;  %v561_v34 = vadd.f32 %v3142_v20, %v560_v26 }
  0xe0   : > { %v2711_v27 = vpop.f32.mrf.mxu0  ;;  %v2727_v28 = vpop.f32.mrf.mxu1 }
  0xe1   : > { %v508_v30 = vadd.f32 %v2711_v27, %v3142_v20  ;;  %v572_v31 = vadd.f32 %v2727_v28, %v3142_v20  ;;  %v623_v45 = vmax.f32 %v497_v33, 0.0  ;;  %v639_v46 = vmax.f32 %v561_v34, 0.0 }
  0xe2   : > { %v499_v35 = vpop.f32.mrf.mxu0  ;;  %v563_v36 = vpop.f32.mrf.mxu1 }
  0xe3   : > { %v626_v37 = vmax.f32 %v508_v30, 0.0  ;;  %v642_v38 = vmax.f32 %v572_v31, 0.0  ;;  %v500_v39 = vadd.f32 %v3142_v20, %v499_v35  ;;  %v564_v40 = vadd.f32 %v3142_v20, %v563_v36 }
  0xe4   : > { %v2714_v9 = vpop.f32.mrf.mxu0  ;;  %v2730_v16 = vpop.f32.mrf.mxu1 }
  0xe5   : > { %v656_v41 = vpack.c.bf16 %v626_v37, %v625_v32  ;;  %v664_v42 = vpack.c.bf16 %v642_v38, %v641_v29  ;;  %v624_v43 = vmax.f32 %v500_v39, 0.0  ;;  %v640_v44 = vmax.f32 %v564_v40, 0.0 }
  0xe6   : > { %v512_v14 = vpop.f32.mrf.mxu0  ;;  %v521_v25 = vadd.f32 %v2714_v9, %v3142_v20  ;;  %v576_v27 = vpop.f32.mrf.mxu1  ;;  %v585_v37 = vadd.f32 %v2730_v16, %v3142_v20 }
  0xe7   : > { %v679_v47 = vshrl.u32 %v656_v41, 16  ;;  %v735_v48 = vshrl.u32 %v664_v42, 16  ;;  %v655_v49 = vpack.c.bf16 %v624_v43, %v623_v45  ;;  %v663_v50 = vpack.c.bf16 %v640_v44, %v639_v46 }
  0xe8   : > { %v682_v52 = vshll.u32 %v656_v41, 16  ;;  %v738_v57 = vshll.u32 %v664_v42, 16  ;;  %v2715_v24 = vpop.f32.mrf.mxu0  ;;  %v629_v35 = vmax.f32 %v521_v25, 0.0  ;;  %v2731_v38 = vpop.f32.mrf.mxu1  ;;  %v645_v44 = vmax.f32 %v585_v37, 0.0 }
  0xe9   : > { %v681_v51 = vrot.slane %v679_v47, 7  ;;  %v737_v53 = vrot.slane %v735_v48, 7  ;;  %v672_v54 = vshrl.u32 %v655_v49, 16  ;;  %v728_v55 = vshrl.u32 %v663_v50, 16 }
  0xea   : > { %v675_v63 = vshll.u32 %v655_v49, 16  ;;  %v731_v0 = vshll.u32 %v663_v50, 16  ;;  %v524_v26 = vadd.f32 %v2715_v24, %v3142_v20  ;;  %v588_v40 = vadd.f32 %v2731_v38, %v3142_v20 }
  0xeb   : > { %v684_v56 = vor.u32 %v682_v52, %v681_v51  ;;  %v740_v59 = vor.u32 %v738_v57, %v737_v53  ;;  %v674_v60 = vrot.slane %v672_v54, 7  ;;  %v730_v61 = vrot.slane %v728_v55, 7  ;;  %v515_v52 = vpop.f32.mrf.mxu0 }
  0xec   : > { %v835_v4 = vsel %vm3152_vm3, %v681_v51, 0  ;;  %v843_v10 = vsel %vm3152_vm3, %v737_v53, 0  ;;  %v630_v36 = vmax.f32 %v524_v26, 0.0  ;;  %v646_v46 = vmax.f32 %v588_v40, 0.0 }
  0xed   : > { %v3158_v62 = vsel %vm3152_vm3, 0, %v684_v56  ;;  %v677_v1 = vor.u32 %v675_v63, %v674_v60  ;;  %v733_v2 = vor.u32 %v731_v0, %v730_v61  ;;  %v3166_v3 = vsel %vm3152_vm3, 0, %v740_v59  ;;  %v579_v63 = vpop.f32.mrf.mxu1 }
  0xee   : > { %1295 = vrot.lane.b32.xlu0 %v3158_v62, %s2991_s9  ;;  %1185 = vrot.lane.b32.xlu1 %v3158_v62, %s2992_s13  ;;  %v1108_v7 = vrot.slane %v3158_v62, 1  ;;  %v1109_v8 = vrot.slane %v835_v4, 1  ;;  %v1132_v12 = vrot.slane %v3166_v3, 1  ;;  %v1133_v13 = vrot.slane %v843_v10, 1 }
  0xef   : > { %v3176_v5 = vsel %vm3152_vm3, 0, %v733_v2  ;;  %v3180_v6 = vsel %vm3152_vm3, 0, %v677_v1  ;;  %v3196_v15 = vsel %vm3152_vm3, %v674_v60, 0  ;;  %v874_v22 = vshll.u32 %v3158_v62, 16 }
  0xf0   : > { %v1110_v11 = vsel %vm1102_vm4, %v1108_v7, %v1109_v8  ;;  %v1134_v17 = vsel %vm1102_vm4, %v1132_v12, %v1133_v13  ;;  %v1105_v21 = vrot.slane %v3180_v6, 1  ;;  %v1106_v23 = vrot.slane %v3196_v15, 1 }
  0xf1   : > { %v3208_v28 = vsel %vm3152_vm3, %v730_v61, 0  ;;  %v1129_v30 = vrot.slane %v3176_v5, 1  ;;  %v876_v31 = vrot.slane %v874_v22, 1  ;;  %v872_v33 = vshrl.u32 %v3158_v62, 16 }
  0xf2   : > { %1311 = vrot.lane.b32.xlu0 %v3166_v3, %s2991_s9  ;;  %1201 = vrot.lane.b32.xlu1 %v3166_v3, %s2992_s13  ;;  %v1107_v29 = vsel %vm1102_vm4, %v1105_v21, %v1106_v23  ;;  %v1130_v32 = vrot.slane %v3208_v28, 1  ;;  %v879_v34 = vshll.u32 %v835_v4, 16  ;;  %v970_v42 = vshll.u32 %v3166_v3, 16 }
  0xf3   : > { %v877_v41 = vor.u32 %v876_v31, %v872_v33  ;;  %v658_v45 = vpack.c.bf16 %v630_v36, %v629_v35  ;;  %v968_v49 = vshrl.u32 %v3166_v3, 16  ;;  %v975_v50 = vshll.u32 %v843_v10, 16 }
  0xf4   : > { %v1131_v39 = vsel %vm1102_vm4, %v1129_v30, %v1130_v32  ;;  %v881_v43 = vrot.slane %v879_v34, 1  ;;  %v972_v48 = vrot.slane %v970_v42, 1  ;;  %v666_v53 = vpack.c.bf16 %v646_v46, %v645_v44 }
  0xf5   : > { %v693_v51 = vshrl.u32 %v658_v45, 16  ;;  %v977_v55 = vrot.slane %v975_v50, 1  ;;  %v513_v56 = vadd.f32 %v3142_v20, %v512_v14  ;;  %v516_v57 = vadd.f32 %v3142_v20, %v515_v52 }
  0xf6   : > { %1309 = vrot.lane.b32.xlu1 %v3176_v5, %s2991_s9  ;;  %1183 = vrot.lane.b32.xlu0 %v3180_v6, %s2992_s13  ;;  %v882_v47 = vsel %vm850_vm5, %v877_v41, %v881_v43  ;;  %v973_v54 = vor.u32 %v972_v48, %v968_v49  ;;  %v696_v60 = vshll.u32 %v658_v45, 16  ;;  %v749_v61 = vshrl.u32 %v666_v53, 16  ;;  %v2718_v49 = vpop.f32.mrf.mxu0 }
  0xf7   : > { %v695_v59 = vrot.slane %v693_v51, 7  ;;  %v627_v1 = vmax.f32 %v513_v56, 0.0  ;;  %v628_v2 = vmax.f32 %v516_v57, 0.0  ;;  %v577_v4 = vadd.f32 %v3142_v20, %v576_v27 }
  0xf8   : > { %v978_v0 = vsel %vm850_vm5, %v973_v54, %v977_v55  ;;  %v580_v7 = vadd.f32 %v3142_v20, %v579_v63  ;;  %v751_v9 = vrot.slane %v749_v61, 7  ;;  %v752_v10 = vshll.u32 %v666_v53, 16  ;;  %v3292_v54 = vpop.f32.mrf.mxu0  ;;  %v2734_v55 = vpop.f32.mrf.mxu1 }
  0xf9   : > { %v698_v8 = vor.u32 %v696_v60, %v695_v59  ;;  %v657_v12 = vpack.c.bf16 %v628_v2, %v627_v1  ;;  %v643_v13 = vmax.f32 %v577_v4, 0.0  ;;  %v956_v22 = vshrl.u32 %v3176_v5, 16 }
  0xfa   : > { %1265 = vrot.lane.b32.xlu1 %v1110_v11, %s2993_s14  ;;  %1199 = vrot.lane.b32.xlu0 %v3176_v5, %s2992_s13  ;;  %v754_v14 = vor.u32 %v752_v10, %v751_v9  ;;  %v644_v16 = vmax.f32 %v580_v7, 0.0  ;;  %v963_v23 = vshll.u32 %v3208_v28, 16  ;;  %v860_v35 = vshrl.u32 %v3180_v6, 16  ;;  %v3306_v1 = vpop.f32.mrf.mxu1 }
  0xfb   : > { %v686_v24 = vshrl.u32 %v657_v12, 16  ;;  %v689_v31 = vshll.u32 %v657_v12, 16  ;;  %v867_v36 = vshll.u32 %v3196_v15, 16  ;;  %v837_v15 = vsel %vm3152_vm3, %v695_v59, 0  ;;  %v2889_v12 = vld [vmem:[%s4203_s3 + $0x20] ss:$0 sps:$4 sm:$0xff]  }
  0xfc   : > { %v665_v25 = vpack.c.bf16 %v644_v16, %v643_v13  ;;  %v3249_v26 = vsel %vm3152_vm3, 0, %v754_v14  ;;  %v965_v30 = vrot.slane %v963_v23, 1  ;;  %v845_v48 = vsel %vm3152_vm3, %v751_v9, 0  ;;  %v2735_v14 = vpop.f32.mrf.mxu1  ;;  %2820 = vmatprep.subr.msk.bf16.mxu1 %vm1730_vm6, %v2889_v12 }
  0xfd   : > { %v688_v32 = vrot.slane %v686_v24, 7  ;;  %v869_v41 = vrot.slane %v867_v36, 1  ;;  %v1138_v51 = vrot.slane %v3249_v26, 1  ;;  %v1139_v52 = vrot.slane %v845_v48, 1 }
  0xfe   : > { %1281 = vrot.lane.b32.xlu1 %v1134_v17, %s2993_s14  ;;  %1359 = vrot.lane.b32.xlu0 %v1110_v11, %s2994_s15  ;;  %v742_v33 = vshrl.u32 %v665_v25, 16  ;;  %v537_v63 = vadd.f32 %v2718_v49, %v3142_v20  ;;  %v1732_v23 = vsel %vm1730_vm6, %v2889_v12, 0  ;;  %v999_v36 = vshll.u32 %v845_v48, 16  ;;  %v2893_v48 = vld [vmem:[%s4203_s3] sm:$0xff]  }
  0xff   : > { %v691_v37 = vor.u32 %v689_v31, %v688_v32  ;;  %v3288_v53 = vsel %vm3152_vm3, %v688_v32, 0  ;;  %v1140_v59 = vsel %vm1102_vm4, %v1138_v51, %v1139_v52  ;;  %2741 = vmatpush3.bf16.msra.mxu1 %v1732_v23 }
 0x100   : > { %v744_v38 = vrot.slane %v742_v33, 7  ;;  %v1112_v57 = vrot.slane %v3288_v53, 1  ;;  %v633_v13 = vmax.f32 %v537_v63, 0.0  ;;  %v595_v63 = vpop.f32.mrf.mxu1 }
 0x101   : > { %v3266_v43 = vsel %vm3152_vm3, 0, %v691_v37  ;;  %v2891_v37 = vld [vmem:[%s4203_s3 + $0x10] sm:$0xff]  }
 0x102   : > { %1154 = vrot.lane.b32.xlu0 %v1110_v11, %s2989_s22  ;;  %1152 = vrot.lane.b32.xlu1 %v1107_v29, %s2989_s22  ;;  %v958_v11 = vshll.u32 %v3176_v5, 16  ;;  %v1111_v56 = vrot.slane %v3266_v43, 1  ;;  %v3303_v61 = vsel %vm3152_vm3, %v744_v38, 0 }
 0x103   : > { %v987_v23 = vshll.u32 %v3303_v61, 16 }
 0x104   : > { %v960_v21 = vrot.slane %v958_v11, 1  ;;  %v3309_v2 = vsel %vm1102_vm4, %v1111_v56, %v1112_v57  ;;  %v903_v11 = vshll.u32 %v837_v15, 16  ;;  %v529_v56 = vadd.f32 %v3142_v20, %v3292_v54 }
 0x106   : > { %1375 = vrot.lane.b32.xlu0 %v1134_v17, %s2994_s15  ;;  %1168 = vrot.lane.b32.xlu1 %v1131_v39, %s2989_s22  ;;  %v961_v27 = vor.u32 %v960_v21, %v956_v22  ;;  %v601_v21 = vadd.f32 %v2734_v55, %v3142_v20  ;;  %v604_v22 = vadd.f32 %v2735_v14, %v3142_v20  ;;  %v886_v55 = vshll.u32 %v3266_v43, 16 }
 0x107   : > { %v631_v54 = vmax.f32 %v529_v56, 0.0 }
 0x108   : > { %v966_v28 = vsel %vm850_vm5, %v961_v27, %v965_v30  ;;  %v905_v27 = vrot.slane %v903_v11, 1  ;;  %v2890_v30 = vld [vmem:[%s4203_s3 + $0x18] sm:$0xff]   ;;  %v649_v32 = vmax.f32 %v601_v21, 0.0  ;;  %v650_v33 = vmax.f32 %v604_v22, 0.0 }
 0x109   : > { %2742 = vmatprep.subr.bf16.mxu1 %v2890_v30 }
 0x10a   : > { %1170 = vrot.lane.b32.xlu0 %v1134_v17, %s2989_s22  ;;  %1229 = vrot.lane.b32.xlu1 %v882_v47, %s2995_s16  ;;  %v3240_v17 = vsel %vm3152_vm3, 0, %v698_v8  ;;  %v1136_v8 = vrot.slane %v3303_v61, 1 }
 0x10b   : > { %v1114_v46 = vrot.slane %v3240_v17, 1  ;;  %v898_v60 = vshll.u32 %v3240_v17, 16  ;;  %v896_v9 = vshrl.u32 %v3240_v17, 16  ;;  %2743 = vmatpush3.bf16.msra.mxu1 %v2890_v30 }
 0x10c   : > { %2744 = vmatprep.subr.bf16.mxu1 %v2891_v37 }
 0x10d   : > { %v900_v10 = vrot.slane %v898_v60, 1 }
 0x10e   : > { %1263 = vrot.lane.b32.xlu0 %v1107_v29, %s2993_s14  ;;  %1043 = vrot.lane.b32.xlu1 %v882_v47, %s2990_s23  ;;  %v862_v29 = vshll.u32 %v3180_v6, 16 }
 0x10f   : > { %2745 = vmatpush3.bf16.msra.mxu1 %v2891_v37 }
 0x110   : > { %v864_v34 = vrot.slane %v862_v29, 1  ;;  %v994_v29 = vshll.u32 %v3249_v26, 16 }
 0x112   : > { %1373 = vrot.lane.b32.xlu0 %v1131_v39, %s2994_s15  ;;  %1245 = vrot.lane.b32.xlu1 %v978_v0, %s2995_s16  ;;  %v865_v40 = vor.u32 %v864_v34, %v860_v35  ;;  %v992_v34 = vshrl.u32 %v3249_v26, 16  ;;  %v996_v35 = vrot.slane %v994_v29, 1 }
 0x114   : > { %v870_v44 = vsel %vm850_vm5, %v865_v40, %v869_v41  ;;  %v997_v40 = vor.u32 %v996_v35, %v992_v34  ;;  %v1001_v41 = vrot.slane %v999_v36, 1 }
 0x116   : > { %1279 = vrot.lane.b32.xlu0 %v1131_v39, %s2993_s14  ;;  %1059 = vrot.lane.b32.xlu1 %v978_v0, %s2990_s23  ;;  %v745_v39 = vshll.u32 %v665_v25, 16  ;;  %v901_v25 = vor.u32 %v900_v10, %v896_v9  ;;  %v593_v9 = vadd.f32 %v3142_v20, %v3306_v1  ;;  %v596_v10 = vadd.f32 %v3142_v20, %v595_v63 }
 0x118   : > { %v747_v42 = vor.u32 %v745_v39, %v744_v38  ;;  %v668_v39 = vpack.c.bf16 %v650_v33, %v649_v32  ;;  %v647_v14 = vmax.f32 %v593_v9, 0.0  ;;  %v989_v32 = vrot.slane %v987_v23, 1 }
 0x11a   : > { %1327 = vrot.lane.b32.xlu0 %v882_v47, %s2996_s17  ;;  %1189 = vrot.lane.b32.xlu1 %v3240_v17, %s2992_s13  ;;  %v3276_v45 = vsel %vm3152_vm3, 0, %v747_v42  ;;  %v1115_v47 = vrot.slane %v837_v15, 1  ;;  %v2892_v42 = vld [vmem:[%s4203_s3 + $0x8] sm:$0xff]   ;;  %v766_v52 = vshll.u32 %v668_v39, 16 }
 0x11b   : > { %v1135_v7 = vrot.slane %v3276_v45, 1  ;;  %2746 = vmatprep.subr.bf16.mxu1 %v2892_v42  ;;  %v980_v21 = vshrl.u32 %v3276_v45, 16 }
 0x11c   : > { %v1116_v50 = vsel %vm1102_vm4, %v1114_v46, %v1115_v47  ;;  %v763_v46 = vshrl.u32 %v668_v39, 16  ;;  %v1002_v47 = vsel %vm850_vm5, %v997_v40, %v1001_v41  ;;  %2747 = vmatpush3.bf16.msra.mxu1 %v2892_v42 }
 0x11d   : > { %v3327_v24 = vsel %vm1102_vm4, %v1135_v7, %v1136_v8  ;;  %2748 = vmatprep.subr.bf16.mxu1 %v2893_v48  ;;  %v891_v7 = vshll.u32 %v3288_v53, 16  ;;  %v982_v53 = vshll.u32 %v3276_v45, 16 }
 0x11e   : > { %1343 = vrot.lane.b32.xlu0 %v978_v0, %s2996_s17  ;;  %1205 = vrot.lane.b32.xlu1 %v3249_v26, %s2992_s13  ;;  %v2719_v0 = vpop.f32.mrf.mxu0  ;;  %v3361_v51 = vrot.slane %v763_v46, 7 }
 0x11f   : > { %v540_v4 = vadd.f32 %v2719_v0, %v3142_v20  ;;  %v884_v0 = vshrl.u32 %v3266_v43, 16  ;;  %v984_v22 = vrot.slane %v982_v53, 1 }
 0x120   : > { %2749 = vmatpush3.bf16.msra.mxu1 %v2893_v48  ;;  %v768_v60 = vor.u32 %v766_v52, %v3361_v51 }
 0x121   : > { %v634_v16 = vmax.f32 %v540_v4, 0.0  ;;  %v888_v4 = vrot.slane %v886_v55, 1 }
 0x122   : > { %1299 = vrot.lane.b32.xlu0 %v3240_v17, %s2991_s9  ;;  %1341 = vrot.lane.b32.xlu1 %v966_v28, %s2996_s17  ;;  %v3386_v11 = vsel %vm3152_vm3, 0, %v768_v60 }
 0x123   : > { %v660_v31 = vpack.c.bf16 %v634_v16, %v633_v13  ;;  %4214 = vst [vmem:[#allocation5_spill] sm:$0xff] %v3386_v11  ;;  %v889_v12 = vor.u32 %v888_v4, %v884_v0  ;;  %v893_v13 = vrot.slane %v891_v7, 1  ;;  %v648_v16 = vmax.f32 %v596_v10, 0.0 }
 0x124   : > { %v1144_v0 = vrot.slane %v3386_v11, 1 }
 0x125   : > { %v707_v38 = vshrl.u32 %v660_v31, 16  ;;  %v710_v15 = vshll.u32 %v660_v31, 16  ;;  %v894_v1 = vsel %vm850_vm5, %v889_v12, %v893_v13  ;;  %v667_v30 = vpack.c.bf16 %v648_v16, %v647_v14 }
 0x126   : > { %1315 = vrot.lane.b32.xlu0 %v3249_v26, %s2991_s9  ;;  %1057 = vrot.lane.b32.xlu1 %v966_v28, %s2990_s23  ;;  %v985_v31 = vor.u32 %v984_v22, %v980_v21 }
 0x128   : > { %v990_v36 = vsel %vm850_vm5, %v985_v31, %v989_v32 }
 0x12a   : > { %1297 = vrot.lane.b32.xlu1 %v3266_v43, %s2991_s9  ;;  %1041 = vrot.lane.b32.xlu0 %v870_v44, %s2990_s23 }
 0x12e   : > { %1313 = vrot.lane.b32.xlu1 %v3276_v45, %s2991_s9  ;;  %1227 = vrot.lane.b32.xlu0 %v870_v44, %s2995_s16  ;;  %v3352_v44 = vrot.slane %v707_v38, 7 }
 0x130   : > { %v712_v49 = vor.u32 %v710_v15, %v3352_v44 }
 0x132   : > { %1269 = vrot.lane.b32.xlu1 %v1116_v50, %s2993_s14  ;;  %1243 = vrot.lane.b32.xlu0 %v966_v28, %s2995_s16  ;;  %v3337_v28 = vsel %vm850_vm5, %v901_v25, %v905_v27  ;;  %v3399_v25 = vpop.permute.xlu1 %1150  ;;  %v3401_v27 = vpop.permute.xlu0 %1039 }
 0x136   : > { %1285 = vrot.lane.b32.xlu1 %v1140_v59, %s2993_s14  ;;  %1187 = vrot.lane.b32.xlu0 %v3266_v43, %s2992_s13 }
 0x13a   : > { %1156 = vrot.lane.b32.xlu1 %v3309_v2, %s2989_s22  ;;  %1203 = vrot.lane.b32.xlu0 %v3276_v45, %s2992_s13 }
 0x13e   : > { %1172 = vrot.lane.b32.xlu1 %v3327_v24, %s2989_s22  ;;  %1363 = vrot.lane.b32.xlu0 %v1116_v50, %s2994_s15 }
 0x142   : > { %1233 = vrot.lane.b32.xlu1 %v3337_v28, %s2995_s16  ;;  %1158 = vrot.lane.b32.xlu0 %v1116_v50, %s2989_s22  ;;  %v531_v50 = vpop.f32.mrf.mxu0 }
 0x143   : > { %v532_v57 = vadd.f32 %v3142_v20, %v531_v50 }
 0x144   : > { %v2722_v48 = vpop.f32.mrf.mxu0 }
 0x145   : > { %v632_v8 = vmax.f32 %v532_v57, 0.0  ;;  %v847_v57 = vsel %vm3152_vm3, %v3361_v51, 0 }
 0x146   : > { %1047 = vrot.lane.b32.xlu1 %v3337_v28, %s2990_s23  ;;  %1379 = vrot.lane.b32.xlu0 %v1140_v59, %s2994_s15  ;;  %v1145_v4 = vrot.slane %v847_v57, 1 }
 0x148   : > { %v3470_v12 = vsel %vm1102_vm4, %v1144_v0, %v1145_v4 }
 0x14a   : > { %1249 = vrot.lane.b32.xlu1 %v1002_v47, %s2995_s16  ;;  %1174 = vrot.lane.b32.xlu0 %v1140_v59, %s2989_s22  ;;  %v3372_v59 = vsel %vm3152_vm3, 0, %v712_v49 }
 0x14b   : > { %v1120_v55 = vrot.slane %v3372_v59, 1  ;;  %v922_v16 = vshll.u32 %v3372_v59, 16  ;;  %v920_v32 = vshrl.u32 %v3372_v59, 16 }
 0x14e   : > { %1063 = vrot.lane.b32.xlu1 %v1002_v47, %s2990_s23  ;;  %1361 = vrot.lane.b32.xlu0 %v3309_v2, %s2994_s15 }
 0x152   : > { %1193 = vrot.lane.b32.xlu1 %v3372_v59, %s2992_s13  ;;  %1267 = vrot.lane.b32.xlu0 %v3309_v2, %s2993_s14  ;;  %v659_v2 = vpack.c.bf16 %v632_v8, %v631_v54  ;;  %v553_v8 = vadd.f32 %v2722_v48, %v3142_v20  ;;  %v3500_v48 = vpop.f32.mrf.mxu1 }
 0x154   : > { %v700_v29 = vshrl.u32 %v659_v2, 16  ;;  %v703_v35 = vshll.u32 %v659_v2, 16 }
 0x156   : > { %1209 = vrot.lane.b32.xlu1 %v3386_v11, %s2992_s13  ;;  %1377 = vrot.lane.b32.xlu0 %v3327_v24, %s2994_s15  ;;  %v702_v34 = vrot.slane %v700_v29, 7 }
 0x158   : > { %v705_v39 = vor.u32 %v703_v35, %v702_v34  ;;  %v3462_v51 = vsel %vm3152_vm3, %v702_v34, 0  ;;  %v924_v34 = vrot.slane %v922_v16, 1 }
 0x159   : > { %v1118_v2 = vrot.slane %v3462_v51, 1 }
 0x15a   : > { %1329 = vrot.lane.b32.xlu1 %v894_v1, %s2996_s17  ;;  %1283 = vrot.lane.b32.xlu0 %v3327_v24, %s2993_s14  ;;  %v756_v24 = vshrl.u32 %v667_v30, 16  ;;  %v3426_v46 = vsel %vm3152_vm3, 0, %v705_v39 }
 0x15b   : > { %v1117_v53 = vrot.slane %v3426_v46, 1 }
 0x15c   : > { %v758_v40 = vrot.slane %v756_v24, 7 }
 0x15d   : > { %v1119_v31 = vsel %vm1102_vm4, %v1117_v53, %v1118_v2  ;;  %v608_v53 = vpop.f32.mrf.mxu1 }
 0x15e   : > { %1045 = vrot.lane.b32.xlu1 %v894_v1, %s2990_s23  ;;  %1331 = vrot.lane.b32.xlu0 %v3337_v28, %s2996_s17  ;;  %v759_v28 = vshll.u32 %v667_v30, 16  ;;  %v3477_v14 = vsel %vm3152_vm3, %v758_v40, 0 }
 0x15f   : > { %v1142_v30 = vrot.slane %v3477_v14, 1 }
 0x160   : > { %v3406_v33 = vpop.permute.xlu0 %1295  ;;  %v3408_v61 = vpop.permute.xlu1 %1185  ;;  %v761_v15 = vor.u32 %v759_v28, %v758_v40  ;;  %v925_v28 = vor.u32 %v924_v34, %v920_v32 }
 0x161   : > { %v3519_v34 = vpop.f32.mrf.mxu1 }
 0x162   : > { %1345 = vrot.lane.b32.xlu1 %v990_v36, %s2996_s17  ;;  %1347 = vrot.lane.b32.xlu0 %v1002_v47, %s2996_s17  ;;  %v839_v47 = vsel %vm3152_vm3, %v3352_v44, 0  ;;  %v3441_v52 = vsel %vm3152_vm3, 0, %v761_v15  ;;  %v3450_v44 = vpop.f32.mrf.mxu0 }
 0x163   : > { %v1121_v56 = vrot.slane %v839_v47, 1  ;;  %v1141_v29 = vrot.slane %v3441_v52, 1  ;;  %v927_v35 = vshll.u32 %v839_v47, 16 }
 0x164   : > { %v3413_v37 = vpop.permute.xlu0 %1311  ;;  %v3415_v38 = vpop.permute.xlu1 %1201 }
 0x165   : > { %v1122_v7 = vsel %vm1102_vm4, %v1120_v55, %v1121_v56  ;;  %v2723_v54 = vpop.f32.mrf.mxu0  ;;  %v1143_v40 = vsel %vm1102_vm4, %v1141_v29, %v1142_v30  ;;  %v929_v15 = vrot.slane %v927_v35, 1  ;;  %v1018_v55 = vshll.u32 %v3386_v11, 16 }
 0x166   : > { %1061 = vrot.lane.b32.xlu1 %v990_v36, %s2990_s23  ;;  %1303 = vrot.lane.b32.xlu0 %v3372_v59, %s2991_s9  ;;  %v556_v13 = vadd.f32 %v2723_v54, %v3142_v20  ;;  %v1016_v54 = vshrl.u32 %v3386_v11, 16  ;;  %v910_v35 = vshll.u32 %v3426_v46, 16 }
 0x167   : > { %v930_v4 = vsel %vm850_vm5, %v925_v28, %v929_v15  ;;  %v547_v29 = vpop.f32.mrf.mxu0 }
 0x168   : > { %v3420_v41 = vpop.permute.xlu1 %1309  ;;  %v3422_v42 = vpop.permute.xlu0 %1183  ;;  %v638_v21 = vmax.f32 %v556_v13, 0.0  ;;  %v1023_v13 = vshll.u32 %v847_v57, 16  ;;  %v545_v57 = vadd.f32 %v3142_v20, %v3450_v44 }
 0x169   : > { %4215 = vst [vmem:[#allocation6_spill] sm:$0xff] %v3420_v41 }
 0x16a   : > { %1301 = vrot.lane.b32.xlu1 %v3426_v46, %s2991_s9  ;;  %1319 = vrot.lane.b32.xlu0 %v3386_v11, %s2991_s9  ;;  %v1025_v32 = vrot.slane %v1023_v13, 1  ;;  %v915_v13 = vshll.u32 %v3462_v51, 16  ;;  %v635_v44 = vmax.f32 %v545_v57, 0.0 }
 0x16c   : > { %v3435_v49 = vpop.permute.xlu1 %1265  ;;  %v3437_v50 = vpop.permute.xlu0 %1199 }
 0x16e   : > { %1317 = vrot.lane.b32.xlu1 %v3441_v52, %s2991_s9  ;;  %1231 = vrot.lane.b32.xlu0 %v894_v1, %s2995_s16  ;;  %v637_v1 = vmax.f32 %v553_v8, 0.0  ;;  %v1020_v8 = vrot.slane %v1018_v55, 1 }
 0x170   : > { %v3452_v60 = vpop.permute.xlu1 %1281  ;;  %v3454_v63 = vpop.permute.xlu0 %1359  ;;  %v662_v24 = vpack.c.bf16 %v638_v21, %v637_v1  ;;  %v1021_v30 = vor.u32 %v1020_v8, %v1016_v54  ;;  %v908_v54 = vshrl.u32 %v3426_v46, 16  ;;  %v912_v8 = vrot.slane %v910_v35, 1 }
 0x171   : > { %v917_v35 = vrot.slane %v915_v13, 1 }
 0x172   : > { %1273 = vrot.lane.b32.xlu1 %v1122_v7, %s2993_s14  ;;  %1247 = vrot.lane.b32.xlu0 %v990_v36, %s2995_s16  ;;  %v721_v47 = vshrl.u32 %v662_v24, 16  ;;  %v724_v16 = vshll.u32 %v662_v24, 16  ;;  %v548_v24 = vadd.f32 %v3142_v20, %v547_v29  ;;  %v3533_v55 = vsel %vm850_vm5, %v1021_v30, %v1025_v32 }
 0x173   : > { %v609_v29 = vadd.f32 %v3142_v20, %v608_v53  ;;  %v913_v51 = vor.u32 %v912_v8, %v908_v54  ;;  %v1011_v8 = vshll.u32 %v3477_v14, 16 }
 0x174   : > { %v3465_v9 = vpop.permute.xlu0 %1154  ;;  %v3467_v10 = vpop.permute.xlu1 %1152  ;;  %v3513_v2 = vrot.slane %v721_v47, 7 }
 0x175   : > { %v611_v47 = vpop.f32.mrf.mxu1  ;;  %v651_v53 = vmax.f32 %v609_v29, 0.0 }
 0x176   : > { %1289 = vrot.lane.b32.xlu1 %v3470_v12, %s2993_s14  ;;  %1191 = vrot.lane.b32.xlu0 %v3426_v46, %s2992_s13  ;;  %v612_v30 = vadd.f32 %v3142_v20, %v611_v47  ;;  %v918_v47 = vsel %vm850_vm5, %v913_v51, %v917_v35 }
 0x178   : > { %v3484_v22 = vpop.permute.xlu0 %1375  ;;  %v3486_v23 = vpop.permute.xlu1 %1168  ;;  %v652_v57 = vmax.f32 %v612_v30, 0.0  ;;  %v1013_v30 = vrot.slane %v1011_v8, 1 }
 0x179   : > { %4216 = vst [vmem:[#allocation7_spill] sm:$0xff] %v3484_v22  ;;  %v1006_v22 = vshll.u32 %v3441_v52, 16 }
 0x17a   : > { %1160 = vrot.lane.b32.xlu1 %v1119_v31, %s2989_s22  ;;  %1207 = vrot.lane.b32.xlu0 %v3441_v52, %s2992_s13 }
 0x17b   : > { %v1008_v54 = vrot.slane %v1006_v22, 1 }
 0x17c   : > { %v3495_v36 = vpop.permute.xlu0 %1170  ;;  %v3497_v39 = vpop.permute.xlu1 %1229 }
 0x17e   : > { %1176 = vrot.lane.b32.xlu1 %v1143_v40, %s2989_s22  ;;  %1367 = vrot.lane.b32.xlu0 %v1122_v7, %s2994_s15 }
 0x180   : > { %v3505_v56 = vpop.permute.xlu0 %1263  ;;  %v3507_v0 = vpop.permute.xlu1 %1043 }
 0x182   : > { %1237 = vrot.lane.b32.xlu1 %v930_v4, %s2995_s16  ;;  %1162 = vrot.lane.b32.xlu0 %v1122_v7, %s2989_s22  ;;  %v726_v7 = vor.u32 %v724_v16, %v3513_v2  ;;  %v636_v16 = vmax.f32 %v548_v24, 0.0 }
 0x184   : > { %v3515_v1 = vpop.permute.xlu0 %1373  ;;  %v3517_v21 = vpop.permute.xlu1 %1245  ;;  %v3548_v32 = vsel %vm3152_vm3, 0, %v726_v7  ;;  %v1004_v7 = vshrl.u32 %v3441_v52, 16 }
 0x185   : > { %4217 = vst [vmem:[#allocation8_spill] sm:$0xff] %v3515_v1 }
 0x186   : > { %1051 = vrot.lane.b32.xlu1 %v930_v4, %s2990_s23  ;;  %1365 = vrot.lane.b32.xlu0 %v1119_v31, %s2994_s15  ;;  %v1009_v29 = vor.u32 %v1008_v54, %v1004_v7 }
 0x188   : > { %v3528_v28 = vpop.permute.xlu0 %1279  ;;  %v3530_v15 = vpop.permute.xlu1 %1059 }
 0x18a   : > { %1253 = vrot.lane.b32.xlu1 %v3533_v55, %s2995_s16  ;;  %1271 = vrot.lane.b32.xlu0 %v1119_v31, %s2993_s14  ;;  %v661_v31 = vpack.c.bf16 %v636_v16, %v635_v44  ;;  %v669_v16 = vpack.c.bf16 %v652_v57, %v651_v53 }
 0x18c   : > { %v3541_v18 = vpop.permute.xlu0 %1327  ;;  %v3543_v11 = vpop.permute.xlu1 %1189  ;;  %v714_v13 = vshrl.u32 %v661_v31, 16  ;;  %v717_v51 = vshll.u32 %v661_v31, 16  ;;  %v1393_v31 = vsel %vm1391_vm7, 0, %v3401_v27  ;;  %v773_v8 = vshll.u32 %v669_v16, 16 }
 0x18d   : > { %v1426_v27 = vsel %vm1424_vm8, %v1393_v31, %v3399_v25 }
 0x18e   : > { %1197 = vrot.lane.b32.xlu1 %v3548_v32, %s2992_s13  ;;  %1381 = vrot.lane.b32.xlu0 %v1143_v40, %s2994_s15  ;;  %v716_v22 = vrot.slane %v714_v13, 7 }
 0x190   : > { %v3554_v24 = vpop.permute.xlu0 %1343  ;;  %v3556_v1 = vpop.permute.xlu1 %1205  ;;  %v719_v57 = vor.u32 %v717_v51, %v716_v22  ;;  %v840_v31 = vsel %vm3152_vm3, %v716_v22, 0 }
 0x191   : > { %4218 = vst [vmem:[#allocation9_spill] sm:$0xff] %v3554_v24 }
 0x192   : > { %1333 = vrot.lane.b32.xlu1 %v918_v47, %s2996_s17  ;;  %1287 = vrot.lane.b32.xlu0 %v1143_v40, %s2993_s14  ;;  %v770_v40 = vshrl.u32 %v669_v16, 16 }
 0x194   : > { %v3563_v41 = vpop.permute.xlu0 %1299  ;;  %v3565_v44 = vpop.permute.xlu1 %1341  ;;  %v3587_v54 = vrot.slane %v770_v40, 7 }
 0x195   : > { %4219 = vst [vmem:[#allocation10_spill] sm:$0xff] %v3565_v44  ;;  %v1014_v44 = vsel %vm850_vm5, %v1009_v29, %v1013_v30 }
 0x196   : > { %1049 = vrot.lane.b32.xlu1 %v918_v47, %s2990_s23  ;;  %1335 = vrot.lane.b32.xlu0 %v930_v4, %s2996_s17  ;;  %v775_v29 = vor.u32 %v773_v8, %v3587_v54 }
 0x198   : > { %v3569_v14 = vpop.permute.xlu0 %1315  ;;  %v1058_v35 = vpop.permute.xlu1 %1057 }
 0x199   : > { %v1411_v24 = vsel %vm1391_vm7, %v3176_v5, %v1058_v35 }
 0x19a   : > { %v1444_v53 = vsel %vm1424_vm8, %v1411_v24, %v3486_v23  ;;  %1349 = vrot.lane.b32.xlu1 %v1014_v44, %s2996_s17  ;;  %1351 = vrot.lane.b32.xlu0 %v3533_v55, %s2996_s17 }
 0x19b   : > { %v1477_v4 = vsel %vm1457_vm9, %v1444_v53, %v3415_v38  ;;  %v1459_v38 = vsel %vm1457_vm9, %v1426_v27, %v3422_v42  ;;  %v841_v42 = vsel %vm3152_vm3, %v3513_v2, 0  ;;  %v1126_v53 = vrot.slane %v3548_v32, 1 }
 0x19c   : > { %v3583_v7 = vpop.permute.xlu1 %1297  ;;  %v3585_v5 = vpop.permute.xlu0 %1041  ;;  %v1509_v23 = vsel %vm413_vm0, %v1477_v4, %v3517_v21  ;;  %v3602_v21 = vsel %vm3152_vm3, 0, %v719_v57  ;;  %v1127_v4 = vrot.slane %v841_v42, 1  ;;  %v617_v57 = vadd.f32 %v3500_v48, %v3142_v20 }
 0x19d   : > { %v1542_v24 = vsel %vm1522_vm10, %v1509_v23, %v3452_v60  ;;  %v951_v23 = vshll.u32 %v841_v42, 16  ;;  %v1123_v22 = vrot.slane %v3602_v21, 1  ;;  %v1124_v48 = vrot.slane %v840_v31, 1 }
 0x19e   : > { %1065 = vrot.lane.b32.xlu1 %v1014_v44, %s2990_s23  ;;  %1307 = vrot.lane.b32.xlu0 %v3548_v32, %s2991_s9  ;;  %v1128_v27 = vsel %vm1102_vm4, %v1126_v53, %v1127_v4 }
 0x1a0   : > { %v1314_v13 = vpop.permute.xlu1 %1313  ;;  %v1228_v16 = vpop.permute.xlu0 %1227 }
 0x1a1   : > { %v3606_v30 = vsel %vm1555_vm11, %v1542_v24, %v1314_v13  ;;  %v1491_v51 = vsel %vm413_vm0, %v1459_v38, %v1228_v16  ;;  %v944_v38 = vshrl.u32 %v3548_v32, 16  ;;  %v1125_v16 = vsel %vm1102_vm4, %v1123_v22, %v1124_v48 }
 0x1a2   : > { %v1524_v25 = vsel %vm1522_vm10, %v1491_v51, %v3505_v56  ;;  %1305 = vrot.lane.b32.xlu1 %v3602_v21, %s2991_s9  ;;  %1235 = vrot.lane.b32.xlu0 %v918_v47, %s2995_s16  ;;  %v3628_v47 = vsel %vm3152_vm3, 0, %v775_v29  ;;  %v953_v51 = vrot.slane %v951_v23, 1 }
 0x1a3   : > { %v1557_v60 = vsel %vm1555_vm11, %v1524_v25, %v3406_v33  ;;  %v946_v33 = vshll.u32 %v3548_v32, 16  ;;  %v934_v25 = vshll.u32 %v3602_v21, 16 }
 0x1a4   : > { %v3619_v35 = vpop.permute.xlu1 %1269  ;;  %v3621_v40 = vpop.permute.xlu0 %1243  ;;  %v1590_v56 = vsel %vm1588_vm12, %v1557_v60, %v3541_v18  ;;  %v620_v18 = vadd.f32 %v3519_v34, %v3142_v20  ;;  %v653_v34 = vmax.f32 %v617_v57, 0.0 }
 0x1a5   : > { %v1623_v2 = vsel %vm1621_vm13, %v1590_v56, %v3454_v63  ;;  %v948_v20 = vrot.slane %v946_v33, 1  ;;  %v936_v4 = vrot.slane %v934_v25, 1  ;;  %v939_v33 = vshll.u32 %v840_v31, 16 }
 0x1a6   : > { %1321 = vrot.lane.b32.xlu1 %v3628_v47, %s2991_s9  ;;  %1251 = vrot.lane.b32.xlu0 %v1014_v44, %s2995_s16  ;;  %v654_v24 = vmax.f32 %v620_v18, 0.0 }
 0x1a7   : > { %2750 = vmatprep.mubr.msk.bf16.mxu1 %vm1697_vm14, %v1623_v2  ;;  %v949_v29 = vor.u32 %v948_v20, %v944_v38  ;;  %v932_v2 = vshrl.u32 %v3602_v21, 16  ;;  %v941_v48 = vrot.slane %v939_v33, 1 }
 0x1a8   : > { %v3643_v63 = vpop.permute.xlu1 %1285  ;;  %v3645_v8 = vpop.permute.xlu0 %1187  ;;  %v670_v42 = vpack.c.bf16 %v654_v24, %v653_v34 }
 0x1a9   : > { %v954_v53 = vsel %vm850_vm5, %v949_v29, %v953_v51  ;;  %v937_v22 = vor.u32 %v936_v4, %v932_v2  ;;  %v1395_v2 = vsel %vm1391_vm7, %v3180_v6, %v3585_v5  ;;  %v1147_v5 = vrot.slane %v3628_v47, 1 }
 0x1aa   : > { %1277 = vrot.lane.b32.xlu1 %v1128_v27, %s2993_s14  ;;  %1195 = vrot.lane.b32.xlu0 %v3602_v21, %s2992_s13  ;;  %v777_v57 = vshrl.u32 %v670_v42, 16  ;;  %v780_v20 = vshll.u32 %v670_v42, 16  ;;  %v1428_v4 = vsel %vm1424_vm8, %v1395_v2, %v3467_v10 }
 0x1ab   : > { %v942_v29 = vsel %vm850_vm5, %v937_v22, %v941_v48  ;;  %v1461_v22 = vsel %vm1457_vm9, %v1428_v4, %v3408_v61 }
 0x1ac   : > { %v3653_v44 = vpop.permute.xlu1 %1156  ;;  %v3655_v13 = vpop.permute.xlu0 %1203  ;;  %v779_v38 = vrot.slane %v777_v57, 7 }
 0x1ae   : > { %1164 = vrot.lane.b32.xlu1 %v1125_v16, %s2989_s22  ;;  %1371 = vrot.lane.b32.xlu0 %v1128_v27, %s2994_s15 }
 0x1b0   : > { %v3661_v60 = vpop.permute.xlu1 %1172  ;;  %v3663_v56 = vpop.permute.xlu0 %1363 }
 0x1b2   : > { %1241 = vrot.lane.b32.xlu1 %v954_v53, %s2995_s16  ;;  %1166 = vrot.lane.b32.xlu0 %v1128_v27, %s2989_s22  ;;  %v782_v27 = vor.u32 %v780_v20, %v779_v38 }
 0x1b4   : > { %v3669_v18 = vpop.permute.xlu1 %1233  ;;  %v1159_v23 = vpop.permute.xlu0 %1158 }
 0x1b6   : > { %1055 = vrot.lane.b32.xlu1 %v954_v53, %s2990_s23  ;;  %1369 = vrot.lane.b32.xlu0 %v1125_v16, %s2994_s15 }
 0x1b8   : > { %v1048_v34 = vpop.permute.xlu1 %1047  ;;  %v3673_v24 = vpop.permute.xlu0 %1379 }
 0x1b9   : > { %v1401_v31 = vsel %vm1391_vm7, %v3240_v17, %v1048_v34  ;;  %v848_v17 = vsel %vm3152_vm3, %v3587_v54, 0 }
 0x1ba   : > { %1337 = vrot.lane.b32.xlu1 %v942_v29, %s2996_s17  ;;  %1275 = vrot.lane.b32.xlu0 %v1125_v16, %s2993_s14  ;;  %v3681_v51 = vsel %vm1424_vm8, %v1401_v31, %v1159_v23  ;;  %v3695_v16 = vsel %vm3152_vm3, 0, %v782_v27  ;;  %v1148_v23 = vrot.slane %v848_v17, 1 }
 0x1bb   : > { %v1218_v54 = vshll.u32 %v3695_v16, 16  ;;  %v1216_v58 = vshrl.u32 %v3695_v16, 16 }
 0x1bc   : > { %v3683_v25 = vpop.permute.xlu1 %1249  ;;  %v1175_v42 = vpop.permute.xlu0 %1174  ;;  %v1149_v20 = vsel %vm1102_vm4, %v1147_v5, %v1148_v23  ;;  %v1030_v23 = vshll.u32 %v3628_v47, 16 }
 0x1be   : > { %1053 = vrot.lane.b32.xlu1 %v942_v29, %s2990_s23  ;;  %1339 = vrot.lane.b32.xlu0 %v954_v53, %s2996_s17  ;;  %v849_v53 = vsel %vm3152_vm3, %v779_v38, 0  ;;  %v1220_v38 = vrot.slane %v1218_v54, 1 }
 0x1bf   : > { %v1223_v34 = vshll.u32 %v849_v53, 16 }
 0x1c0   : > { %v1064_v33 = vpop.permute.xlu1 %1063  ;;  %v1362_v57 = vpop.permute.xlu0 %1361  ;;  %v1221_v27 = vor.u32 %v1220_v38, %v1216_v58 }
 0x1c1   : > { %v1417_v6 = vsel %vm1391_vm7, %v3249_v26, %v1064_v33 }
 0x1c2   : > { %1067 = vrot.lane.b32.xlu1 %v3533_v55, %s2990_s23  ;;  %1239 = vrot.lane.b32.xlu0 %v942_v29, %s2995_s16  ;;  %v3709_v10 = vsel %vm1424_vm8, %v1417_v6, %v1175_v42  ;;  %v1493_v55 = vsel %vm413_vm0, %v1461_v22, %v3497_v39  ;;  %v1225_v42 = vrot.slane %v1223_v34, 1  ;;  %v1261_v39 = vrot.slane %v849_v53, 1 }
 0x1c3   : > { %v1526_v29 = vsel %vm1522_vm10, %v1493_v55, %v3435_v49  ;;  %v1260_v49 = vrot.slane %v3695_v16, 1  ;;  %v1028_v53 = vshrl.u32 %v3628_v47, 16  ;;  %v1032_v34 = vrot.slane %v1030_v23, 1 }
 0x1c4   : > { %v3713_v26 = vpop.permute.xlu1 %1193  ;;  %v3715_v48 = vpop.permute.xlu0 %1267  ;;  %v1559_v4 = vsel %vm1555_vm11, %v1526_v29, %v3583_v7  ;;  %v1226_v5 = vsel %vm850_vm5, %v1221_v27, %v1225_v42  ;;  %v1035_v55 = vshll.u32 %v848_v17, 16 }
 0x1c5   : > { %v1262_v38 = vsel %vm1102_vm4, %v1260_v49, %v1261_v39  ;;  %v1033_v17 = vor.u32 %v1032_v34, %v1028_v53 }
 0x1c6   : > { %1180 = vrot.lane.b32.xlu1 %v1149_v20, %s2989_s22  ;;  %1383 = vrot.lane.b32.xlu0 %v3470_v12, %s2994_s15 }
 0x1c8   : > { %v3724_v31 = vpop.permute.xlu1 %1209  ;;  %v1378_v61 = vpop.permute.xlu0 %1377 }
 0x1ca   : > { %1213 = vrot.lane.b32.xlu1 %v3695_v16, %s2992_s13  ;;  %1385 = vrot.lane.b32.xlu0 %v1149_v20, %s2994_s15 }
 0x1cc   : > { %v1330_v2 = vpop.permute.xlu1 %1329  ;;  %v3733_v33 = vpop.permute.xlu0 %1283 }
 0x1cd   : > { %v1592_v6 = vsel %vm1588_vm12, %v1559_v4, %v1330_v2  ;;  %v1037_v2 = vrot.slane %v1035_v55, 1  ;;  %v4220_v4 = vmov 0  }
 0x1ce   : > { %v1625_v54 = vsel %vm1621_vm13, %v1592_v6, %v1362_v57  ;;  %1257 = vrot.lane.b32.xlu1 %v1226_v5, %s2995_s16  ;;  %1178 = vrot.lane.b32.xlu0 %v3470_v12, %s2989_s22 }
 0x1cf   : > { %2751 = vmatmul.mubr.msk.bf16.vlgmr.msra.gmra.mxu1 %vm1697_vm14, %v1625_v54 }
 0x1d0   : > { %v1046_v7 = vpop.permute.xlu1 %1045  ;;  %v1332_v22 = vpop.permute.xlu0 %1331 }
 0x1d1   : > { %v1399_v58 = vsel %vm1391_vm7, %v3266_v43, %v1046_v7 }
 0x1d2   : > { %v1432_v57 = vsel %vm1424_vm8, %v1399_v58, %v3653_v44  ;;  %1293 = vrot.lane.b32.xlu1 %v1262_v38, %s2993_s14  ;;  %1211 = vrot.lane.b32.xlu0 %v3628_v47, %s2992_s13 }
 0x1d3   : > { %v1465_v12 = vsel %vm1457_vm9, %v1432_v57, %v3543_v11 }
 0x1d4   : > { %v1346_v29 = vpop.permute.xlu1 %1345  ;;  %v1348_v27 = vpop.permute.xlu0 %1347  ;;  %v1497_v43 = vsel %vm413_vm0, %v1465_v12, %v3669_v18 }
 0x1d5   : > { %v1608_v42 = vsel %vm1588_vm12, %v3606_v30, %v1346_v29  ;;  %v1530_v44 = vsel %vm1522_vm10, %v1497_v43, %v3619_v35  ;;  %v1038_v30 = vsel %vm850_vm5, %v1033_v17, %v1037_v2 }
 0x1d6   : > { %1325 = vrot.lane.b32.xlu1 %v4220_v4, %s2991_s9  ;;  %1291 = vrot.lane.b32.xlu0 %v1149_v20, %s2993_s14  ;;  %v3765_v11 = vsel %vm1621_vm13, %v1608_v42, %v1378_v61  ;;  %v1397_v20 = vsel %vm1391_vm7, %v3158_v62, %v3507_v0  ;;  %v1413_v62 = vsel %vm1391_vm7, %v3166_v3, %v3530_v15 }
 0x1d7   : > { %v1446_v3 = vsel %vm1424_vm8, %v1413_v62, %v3495_v36 }
 0x1d8   : > { %v1062_v39 = vpop.permute.xlu1 %1061  ;;  %v3767_v6 = vpop.permute.xlu0 %1303  ;;  %v1479_v15 = vsel %vm1457_vm9, %v1446_v3, %v3655_v13 }
 0x1d9   : > { %v1415_v18 = vsel %vm1391_vm7, %v3276_v45, %v1062_v39 }
 0x1da   : > { %v1448_v49 = vsel %vm1424_vm8, %v1415_v18, %v3661_v60  ;;  %1353 = vrot.lane.b32.xlu1 %v1038_v30, %s2996_s17  ;;  %1323 = vrot.lane.b32.xlu0 %v3695_v16, %s2991_s9  ;;  %s2997_s9 = smov [#allocation2]  }
 0x1db   : > { %v1481_v35 = vsel %vm1457_vm9, %v1448_v49, %v3556_v1  ;;  %v1430_v1 = vsel %vm1424_vm8, %v1397_v20, %v3465_v9  ;;  %s2930_s13 = sshll.u32 %s2997_s9, 4  ;;  %s2931_s13 = int_to_ptr.vmem [resolvable:$false] %s2930_s13 }
 0x1dc   : > { %v1302_v61 = vpop.permute.xlu1 %1301  ;;  %v3782_v23 = vpop.permute.xlu0 %1319  ;;  %v1513_v45 = vsel %vm413_vm0, %v1481_v35, %v3683_v25  ;;  %v1463_v0 = vsel %vm1457_vm9, %v1430_v1, %v3645_v8  ;;  %s2932_s14 = scalar_lea.vmem %s2931_s13, 4096 }
 0x1dd   : > { %v1546_v60 = vsel %vm1522_vm10, %v1513_v45, %v3643_v63 }
 0x1de   : > { %1069 = vrot.lane.b32.xlu1 %v1038_v30, %s2990_s23  ;;  %1355 = vrot.lane.b32.xlu0 %v1226_v5, %s2996_s17 }
 0x1e0   : > { %v1318_v16 = vpop.permute.xlu1 %1317  ;;  %v1232_v54 = vpop.permute.xlu0 %1231 }
 0x1e1   : > { %v1579_v25 = vsel %vm1555_vm11, %v1546_v60, %v1318_v16  ;;  %v1495_v63 = vsel %vm413_vm0, %v1463_v0, %v1232_v54 }
 0x1e2   : > { %v1528_v7 = vsel %vm1522_vm10, %v1495_v63, %v3715_v48  ;;  %1357 = vrot.lane.b32.xlu1 %v3133_v19, %s2996_s17  ;;  %1255 = vrot.lane.b32.xlu0 %v1038_v30, %s2995_s16  ;;  %s269_s17 = sand.u32 1, %s2978_s25  }
 0x1e3   : > { %v1561_v9 = vsel %vm1555_vm11, %v1528_v7, %v3563_v41  ;;  %s2500_s18 = sshll.u32 %s269_s17, 7 }
 0x1e4   : > { %v3810_v8 = vpop.permute.xlu1 %1273  ;;  %v1248_v5 = vpop.permute.xlu0 %1247  ;;  %v1594_v53 = vsel %vm1588_vm12, %v1561_v9, %v1332_v22  ;;  %s4039_s19 = scalar_lea.vmem [#allocation2], %s2500_s18 }
 0x1e5   : > { %v1511_v48 = vsel %vm413_vm0, %v1479_v15, %v1248_v5  ;;  %v1627_v58 = vsel %vm1621_vm13, %v1594_v53, %v3663_v56  ;;  %s2434_s20 = sshll.u32 %s4039_s19, 4  ;;  %s4152_s20 = int_to_ptr.vmem [resolvable:$true] %s2434_s20 }
 0x1e6   : > { %v1544_v34 = vsel %vm1522_vm10, %v1511_v48, %v3733_v33  ;;  %1389 = vrot.lane.b32.xlu1 %v3133_v19, %s2994_s15  ;;  %1387 = vrot.lane.b32.xlu0 %v1262_v38, %s2994_s15  ;;  %s2926_s23 = scalar_lea.vmem %s4152_s20, 2048  ;;  %p2933_p0 = scmp.lt.s32.totalorder %s4152_s20, %s2931_s13 }
 0x1e7   : > { %v1577_v41 = vsel %vm1555_vm11, %v1544_v34, %v3569_v14  ;;  %2754 = vmatprep.mubr.msk.bf16.mxu1 %vm1697_vm14, %v1627_v58  ;;  %v1943_v58 = vld [vmem:[%s4205_s5] sm:$0xf]  ;;  %p2927_p11 = scmp.ne.s32.totalorder %s4152_s20, %s2926_s23  ;;  %p2934_p1 = scmp.lt.s32.totalorder %s2932_s14, %s2926_s23 }
 0x1e8   : > { %v1290_v36 = vpop.permute.xlu1 %1289  ;;  %v1192_v13 = vpop.permute.xlu0 %1191  ;;  %v1610_v22 = vsel %vm1588_vm12, %v1577_v41, %v1348_v27  ;;  %2821 = vmatprep.subr.msk.bf16.mxu0 %vm1730_vm6, %v1943_v58  ;;  %v2000_v34 = vsel %vm1730_vm6, %v1943_v58, 0 }
 0x1e9   : > { %v3827_v56 = vsel %vm1621_vm13, %v1610_v22, %v3673_v24  ;;  %v1563_v24 = vsel %vm1555_vm11, %v1530_v44, %v1302_v61  ;;  %v1467_v16 = vsel %vm1457_vm9, %v3681_v51, %v1192_v13  ;;  %2783 = vmatpush3.bf16.msra.mxu0 %v2000_v34  ;;  %p2928_p12 = pnand %p2927_p11, %p3077_p5  ;;  %p2935_p2 = por %p2934_p1, %p2933_p0 }
 0x1eb   : > { %p2929_p13 = pneg %p2928_p12 }
 0x1ec   : > { %v1161_v55 = vpop.permute.xlu1 %1160  ;;  %v1208_v33 = vpop.permute.xlu0 %1207 }
 0x1ed   : > { %v1483_v19 = vsel %vm1457_vm9, %v3709_v10, %v1208_v33  ;;  %p2936_p3 = pnand %p2935_p2, %p2929_p13 }
 0x1f0   : > { %v1177_v57 = vpop.permute.xlu1 %1176  ;;  %v1368_v38 = vpop.permute.xlu0 %1367 }
 0x1f4   : > { %v1238_v12 = vpop.permute.xlu1 %1237  ;;  %v3831_v29 = vpop.permute.xlu0 %1162 }
 0x1f8   : > { %v3833_v14 = vpop.permute.xlu1 %1051  ;;  %v1366_v43 = vpop.permute.xlu0 %1365 }
 0x1fc   : > { %v1254_v42 = vpop.permute.xlu1 %1253  ;;  %v1272_v17 = vpop.permute.xlu0 %1271 }
 0x200   : > { %v3835_v27 = vpop.permute.xlu1 %1197  ;;  %v1382_v2 = vpop.permute.xlu0 %1381 }
 0x204   : > { %v1334_v4 = vpop.permute.xlu1 %1333  ;;  %v1288_v39 = vpop.permute.xlu0 %1287 }
 0x205   : > { %v1596_v18 = vsel %vm1588_vm12, %v1563_v24, %v1334_v4 }
 0x206   : > { %v1629_v10 = vsel %vm1621_vm13, %v1596_v18, %v1366_v43 }
 0x207   : > { %2755 = vmatmul.mubr.msk.bf16.gmra.mxu1 %vm1697_vm14, %v1629_v10 }
 0x208   : > { %v1050_v30 = vpop.permute.xlu1 %1049  ;;  %v1336_v49 = vpop.permute.xlu0 %1335 }
 0x209   : > { %v1403_v13 = vsel %vm1391_vm7, %v3426_v46, %v1050_v30 }
 0x20c   : > { %v1350_v35 = vpop.permute.xlu1 %1349  ;;  %v3841_v20 = vpop.permute.xlu0 %1351 }
 0x20d   : > { %v1612_v45 = vsel %vm1588_vm12, %v1579_v25, %v1350_v35 }
 0x20e   : > { %v3845_v60 = vsel %vm1621_vm13, %v1612_v45, %v1382_v2 }
 0x210   : > { %v1066_v1 = vpop.permute.xlu1 %1065  ;;  %v3847_v44 = vpop.permute.xlu0 %1307 }
 0x211   : > { %v1419_v61 = vsel %vm1391_vm7, %v3441_v52, %v1066_v1 }
 0x212   : > { %v1452_v62 = vsel %vm1424_vm8, %v1419_v61, %v1177_v57 }
 0x213   : > { %v1485_v0 = vsel %vm1457_vm9, %v1452_v62, %v3724_v31 }
 0x214   : > { %v1306_v54 = vpop.permute.xlu1 %1305  ;;  %v1236_v63 = vpop.permute.xlu0 %1235  ;;  %v1517_v25 = vsel %vm413_vm0, %v1485_v0, %v1254_v42 }
 0x215   : > { %v1499_v7 = vsel %vm413_vm0, %v1467_v16, %v1236_v63  ;;  %v3859_v3 = vsel %vm1522_vm10, %v1517_v25, %v1290_v36  ;;  %v4221_v16 = vld [vmem:[#allocation6_spill] sm:$0xff] }
 0x216   : > { %v1532_v9 = vsel %vm1522_vm10, %v1499_v7, %v1272_v17 }
 0x217   : > { %v1565_v52 = vsel %vm1555_vm11, %v1532_v9, %v3767_v6 }
 0x218   : > { %v3864_v15 = vpop.permute.xlu1 %1321  ;;  %v1252_v31 = vpop.permute.xlu0 %1251  ;;  %v1598_v5 = vsel %vm1588_vm12, %v1565_v52, %v1336_v49  ;;  %v4223_v52 = vld [vmem:[#allocation9_spill] sm:$0xff] }
 0x219   : > { %v1515_v51 = vsel %vm413_vm0, %v1483_v19, %v1252_v31  ;;  %v1631_v53 = vsel %vm1621_vm13, %v1598_v5, %v1368_v38  ;;  %v1436_v19 = vsel %vm1424_vm8, %v1403_v13, %v1161_v55  ;;  %v4224_v5 = vld [vmem:[#allocation8_spill] sm:$0xff] }
 0x21a   : > { %v1548_v48 = vsel %vm1522_vm10, %v1515_v51, %v1288_v39  ;;  %2758 = vmatprep.mubr.msk.bf16.mxu1 %vm1697_vm14, %v1631_v53 }
 0x21b   : > { %v3876_v6 = vsel %vm1555_vm11, %v1548_v48, %v3782_v23  ;;  %v1469_v23 = vsel %vm1457_vm9, %v1436_v19, %v3713_v26 }
 0x21c   : > { %v1278_v41 = vpop.permute.xlu1 %1277  ;;  %v1196_v36 = vpop.permute.xlu0 %1195  ;;  %v1501_v43 = vsel %vm413_vm0, %v1469_v23, %v1238_v12  ;;  %v1614_v19 = vsel %vm1588_vm12, %v3876_v6, %v3841_v20  ;;  %v4226_v6 = vld [vmem:[#allocation5_spill] sm:$0xff] }
 0x21d   : > { %v1534_v46 = vsel %vm1522_vm10, %v1501_v43, %v3810_v8 }
 0x21e   : > { %v1567_v4 = vsel %vm1555_vm11, %v1534_v46, %v1306_v54  ;;  %v4222_v54 = vld [vmem:[#allocation10_spill] sm:$0xff] }
 0x220   : > { %v1165_v22 = vpop.permute.xlu1 %1164  ;;  %v1372_v33 = vpop.permute.xlu0 %1371 }
 0x224   : > { %v1242_v57 = vpop.permute.xlu1 %1241  ;;  %v1167_v38 = vpop.permute.xlu0 %1166 }
 0x228   : > { %v1056_v42 = vpop.permute.xlu1 %1055  ;;  %v1370_v17 = vpop.permute.xlu0 %1369 }
 0x229   : > { %v1409_v2 = vsel %vm1391_vm7, %v3548_v32, %v1056_v42  ;;  %v1405_v32 = vsel %vm1391_vm7, %v3372_v59, %v3833_v14 }
 0x22a   : > { %v1442_v24 = vsel %vm1424_vm8, %v1409_v2, %v1167_v38  ;;  %v1438_v45 = vsel %vm1424_vm8, %v1405_v32, %v3831_v29 }
 0x22b   : > { %v1475_v55 = vsel %vm1457_vm9, %v1442_v24, %v3437_v50  ;;  %v1471_v1 = vsel %vm1457_vm9, %v1438_v45, %v1196_v36 }
 0x22c   : > { %v1338_v39 = vpop.permute.xlu1 %1337  ;;  %v1276_v18 = vpop.permute.xlu0 %1275  ;;  %v1507_v10 = vsel %vm413_vm0, %v1475_v55, %v3621_v40 }
 0x22d   : > { %v1600_v26 = vsel %vm1588_vm12, %v1567_v4, %v1338_v39  ;;  %v1540_v35 = vsel %vm1522_vm10, %v1507_v10, %v3528_v28 }
 0x22e   : > { %v1633_v12 = vsel %vm1621_vm13, %v1600_v26, %v1370_v17  ;;  %v1573_v0 = vsel %vm1555_vm11, %v1540_v35, %v3413_v37 }
 0x22f   : > { %2759 = vmatmul.mubr.msk.bf16.gmra.mxu1 %vm1697_vm14, %v1633_v12  ;;  %v1606_v31 = vsel %vm1588_vm12, %v1573_v0, %v4223_v52 }
 0x230   : > { %v1054_v8 = vpop.permute.xlu1 %1053  ;;  %v1340_v30 = vpop.permute.xlu0 %1339 }
 0x231   : > { %v1407_v50 = vsel %vm1391_vm7, %v3602_v21, %v1054_v8 }
 0x232   : > { %v1440_v49 = vsel %vm1424_vm8, %v1407_v50, %v1165_v22 }
 0x233   : > { %v1473_v40 = vsel %vm1457_vm9, %v1440_v49, %v3835_v27 }
 0x234   : > { %v1505_v59 = vsel %vm413_vm0, %v1473_v40, %v1242_v57  ;;  %v1068_v14 = vpop.permute.xlu1 %1067  ;;  %v1240_v61 = vpop.permute.xlu0 %1239  ;;  %v3975_v40 = vld [vmem:[%s4204_s4] ss:$0 sm:$0xff] }
 0x235   : > { %v1503_v62 = vsel %vm413_vm0, %v1471_v1, %v1240_v61  ;;  %v1538_v21 = vsel %vm1522_vm10, %v1505_v59, %v1278_v41  ;;  %v1421_v17 = vsel %vm1391_vm7, %v4226_v6, %v1068_v14 }
 0x236   : > { %v1536_v28 = vsel %vm1522_vm10, %v1503_v62, %v1276_v18  ;;  %v1571_v29 = vsel %vm1555_vm11, %v1538_v21, %v4221_v16 }
 0x237   : > { %v1569_v27 = vsel %vm1555_vm11, %v1536_v28, %v3847_v44  ;;  %v1604_v63 = vsel %vm1588_vm12, %v1571_v29, %v4222_v54  ;;  %v4225_v44 = vld [vmem:[#allocation7_spill] sm:$0xff] }
 0x238   : > { %v1181_v25 = vpop.permute.xlu1 %1180  ;;  %v1384_v7 = vpop.permute.xlu0 %1383  ;;  %v1602_v9 = vsel %vm1588_vm12, %v1569_v27, %v1340_v30  ;;  %v1637_v51 = vsel %vm1621_vm13, %v1604_v63, %v4224_v5  ;;  %v1639_v53 = vsel %vm1621_vm13, %v1606_v31, %v4225_v44 }
 0x239   : > { %v1635_v37 = vsel %vm1621_vm13, %v1602_v9, %v1372_v33  ;;  %v1647_v57 = vsel %vm1621_vm13, %v1614_v19, %v1384_v7 }
 0x23a   : > { %2762 = vmatprep.mubr.msk.bf16.mxu1 %vm1697_vm14, %v1635_v37 }
 0x23b   : > { %2763 = vmatmul.mubr.msk.bf16.gmra.mxu1 %vm1697_vm14, %v1637_v51 }
 0x23c   : > { %v1214_v48 = vpop.permute.xlu1 %1213  ;;  %2766 = vmatprep.mubr.msk.bf16.mxu1 %vm1697_vm14, %v1639_v53  ;;  %v1386_v58 = vpop.permute.xlu0 %1385 }
 0x240   : > { %v1258_v34 = vpop.permute.xlu1 %1257  ;;  %v1179_v41 = vpop.permute.xlu0 %1178 }
 0x241   : > { %v1454_v24 = vsel %vm1424_vm8, %v1421_v17, %v1179_v41 }
 0x243   : > { %2767 = vmatmul.mubr.msk.bf16.gmra.mxu1 %vm1697_vm14, %v3765_v11 }
 0x244   : > { %v1294_v36 = vpop.permute.xlu1 %1293  ;;  %2770 = vmatprep.mubr.msk.bf16.mxu1 %vm1697_vm14, %v3827_v56  ;;  %v1212_v13 = vpop.permute.xlu0 %1211  ;;  %v1583_v56 = vsel %vm1555_vm11, %v3859_v3, %v3864_v15 }
 0x245   : > { %v1487_v3 = vsel %vm1457_vm9, %v1454_v24, %v1212_v13 }
 0x248   : > { %v1326_v22 = vpop.permute.xlu1 %1325  ;;  %v1292_v33 = vpop.permute.xlu0 %1291 }
 0x24b   : > { %2771 = vmatmul.mubr.msk.bf16.gmra.mxu1 %vm1697_vm14, %v3845_v60 }
 0x24c   : > { %v1354_v38 = vpop.permute.xlu1 %1353  ;;  %2774 = vmatprep.mubr.msk.bf16.mxu1 %vm1697_vm14, %v1647_v57  ;;  %v1324_v11 = vpop.permute.xlu0 %1323 }
 0x24d   : > { %v1616_v23 = vsel %vm1588_vm12, %v1583_v56, %v1354_v38 }
 0x24e   : > { %v1649_v2 = vsel %vm1621_vm13, %v1616_v23, %v1386_v58 }
 0x250   : > { %v1070_v43 = vpop.permute.xlu1 %1069  ;;  %v1356_v42 = vpop.permute.xlu0 %1355 }
 0x251   : > { %v1423_v20 = vsel %vm1391_vm7, %v3628_v47, %v1070_v43 }
 0x252   : > { %v1456_v60 = vsel %vm1424_vm8, %v1423_v20, %v1181_v25 }
 0x253   : > { %v1489_v46 = vsel %vm1457_vm9, %v1456_v60, %v1214_v48  ;;  %2775 = vmatmul.mubr.msk.bf16.gmra.mxu1 %vm1697_vm14, %v1649_v2 }
 0x254   : > { %v1521_v15 = vsel %vm413_vm0, %v1489_v46, %v1258_v34  ;;  %v1358_v4 = vpop.permute.xlu1 %1357  ;;  %v1256_v55 = vpop.permute.xlu0 %1255 }
 0x255   : > { %v1554_v47 = vsel %vm1522_vm10, %v1521_v15, %v1294_v36  ;;  %v1519_v39 = vsel %vm413_vm0, %v1487_v3, %v1256_v55 }
 0x256   : > { %v1587_v18 = vsel %vm1555_vm11, %v1554_v47, %v1326_v22  ;;  %v1552_v26 = vsel %vm1522_vm10, %v1519_v39, %v1292_v33 }
 0x257   : > { %v1620_v12 = vsel %vm1588_vm12, %v1587_v18, %v1358_v4  ;;  %v1585_v10 = vsel %vm1555_vm11, %v1552_v26, %v1324_v11 }
 0x258   : > { %v1390_v32 = vpop.permute.xlu1 %1389  ;;  %v1618_v8 = vsel %vm1588_vm12, %v1585_v10, %v1356_v42  ;;  %v1388_v30 = vpop.permute.xlu0 %1387 }
 0x259   : > { %v1653_v50 = vsel %vm1621_vm13, %v1620_v12, %v1390_v32  ;;  %v1651_v49 = vsel %vm1621_vm13, %v1618_v8, %v1388_v30 }
 0x25a   : > { %2778 = vmatprep.mubr.msk.bf16.mxu1 %vm1697_vm14, %v1651_v49 }
 0x25b   : > { %2779 = vmatmul.mubr.msk.bf16.gmra.mxu1 %vm1697_vm14, %v1653_v50 }
 0x28f   : > { %v2752_v35 = vpop.f32.mrf.mxu1 }
 0x290   : > { %v1777_v61 = vadd.f32 %v2752_v35, %v3975_v40 }
 0x291   : > { %v1768_v45 = vpop.f32.mrf.mxu1 }
 0x292   : > { %v1769_v59 = vadd.f32 %v3975_v40, %v1768_v45  ;;  %v1897_v29 = vmax.f32 %v1777_v61, 0.0 }
 0x293   : > { %v2753_v1 = vpop.f32.mrf.mxu1 }
 0x294   : > { %v1780_v14 = vadd.f32 %v2753_v1, %v3975_v40  ;;  %v1895_v28 = vmax.f32 %v1769_v59, 0.0 }
 0x295   : > { %v1771_v62 = vpop.f32.mrf.mxu1 }
 0x296   : > { %v1772_v21 = vadd.f32 %v3975_v40, %v1771_v62  ;;  %v1898_v0 = vmax.f32 %v1780_v14, 0.0 }
 0x298   : > { %v1896_v16 = vmax.f32 %v1772_v21, 0.0  ;;  %v1928_v54 = vpack.c.bf16 %v1898_v0, %v1897_v29 }
 0x29a   : > { %v1927_v27 = vpack.c.bf16 %v1896_v16, %v1895_v28 }
 0x29c   : > { %2784 = vmatprep.mubr.msk.bf16.mxu0 %vm1391_vm7, %v1927_v27 }
 0x29d   : > { %2785 = vmatmul.mubr.msk.bf16.vlgmr.msra.gmra.mxu0 %vm1391_vm7, %v1928_v54 }
 0x2c7   : > { %v2756_v63 = vpop.f32.mrf.mxu1 }
 0x2c8   : > { %v1793_v31 = vadd.f32 %v2756_v63, %v3975_v40 }
 0x2c9   : > { %v1784_v25 = vpop.f32.mrf.mxu1 }
 0x2ca   : > { %v1785_v9 = vadd.f32 %v3975_v40, %v1784_v25  ;;  %v1901_v48 = vmax.f32 %v1793_v31, 0.0 }
 0x2cb   : > { %v2757_v7 = vpop.f32.mrf.mxu1 }
 0x2cc   : > { %v1796_v52 = vadd.f32 %v2757_v7, %v3975_v40  ;;  %v1899_v44 = vmax.f32 %v1785_v9, 0.0 }
 0x2cd   : > { %v1787_v37 = vpop.f32.mrf.mxu1 }
 0x2ce   : > { %v1788_v5 = vadd.f32 %v3975_v40, %v1787_v37  ;;  %v1902_v51 = vmax.f32 %v1796_v52, 0.0 }
 0x2d0   : > { %v1900_v53 = vmax.f32 %v1788_v5, 0.0  ;;  %v1930_v34 = vpack.c.bf16 %v1902_v51, %v1901_v48 }
 0x2d2   : > { %v1929_v58 = vpack.c.bf16 %v1900_v53, %v1899_v44 }
 0x2d4   : > { %2788 = vmatprep.mubr.msk.bf16.mxu0 %vm1391_vm7, %v1929_v58 }
 0x2d5   : > { %2789 = vmatmul.mubr.msk.bf16.gmra.mxu0 %vm1391_vm7, %v1930_v34 }
 0x2ef   : > { %v2760_v41 = vpop.f32.mrf.mxu1 }
 0x2f0   : > { %v1809_v19 = vadd.f32 %v2760_v41, %v3975_v40 }
 0x2f1   : > { %v1800_v36 = vpop.f32.mrf.mxu1 }
 0x2f2   : > { %v1801_v22 = vadd.f32 %v3975_v40, %v1800_v36  ;;  %v1905_v43 = vmax.f32 %v1809_v19, 0.0 }
 0x2f3   : > { %v2761_v13 = vpop.f32.mrf.mxu1 }
 0x2f4   : > { %v1812_v33 = vadd.f32 %v2761_v13, %v3975_v40  ;;  %v1903_v56 = vmax.f32 %v1801_v22, 0.0 }
 0x2f5   : > { %v1803_v57 = vpop.f32.mrf.mxu1 }
 0x2f6   : > { %v1804_v38 = vadd.f32 %v3975_v40, %v1803_v57  ;;  %v1906_v11 = vmax.f32 %v1812_v33, 0.0 }
 0x2f8   : > { %v1904_v23 = vmax.f32 %v1804_v38, 0.0  ;;  %v1932_v20 = vpack.c.bf16 %v1906_v11, %v1905_v43 }
 0x2fa   : > { %v1931_v42 = vpack.c.bf16 %v1904_v23, %v1903_v56 }
 0x2fb   : > { %v2764_v6 = vpop.f32.mrf.mxu1 }
 0x2fc   : > { %2792 = vmatprep.mubr.msk.bf16.mxu0 %vm1391_vm7, %v1931_v42  ;;  %v1825_v46 = vadd.f32 %v2764_v6, %v3975_v40 }
 0x2fd   : > { %v1816_v17 = vpop.f32.mrf.mxu1  ;;  %2793 = vmatmul.mubr.msk.bf16.gmra.mxu0 %vm1391_vm7, %v1932_v20 }
 0x2fe   : > { %v1817_v2 = vadd.f32 %v3975_v40, %v1816_v17  ;;  %v1909_v18 = vmax.f32 %v1825_v46, 0.0 }
 0x2ff   : > { %v2765_v60 = vpop.f32.mrf.mxu1 }
 0x300   : > { %v1828_v24 = vadd.f32 %v2765_v60, %v3975_v40  ;;  %v1907_v47 = vmax.f32 %v1817_v2, 0.0 }
 0x301   : > { %v1819_v3 = vpop.f32.mrf.mxu1 }
 0x302   : > { %v1820_v15 = vadd.f32 %v3975_v40, %v1819_v3  ;;  %v1910_v4 = vmax.f32 %v1828_v24, 0.0 }
 0x303   : > { %v2768_v55 = vpop.f32.mrf.mxu1 }
 0x304   : > { %v1908_v39 = vmax.f32 %v1820_v15, 0.0  ;;  %v1934_v10 = vpack.c.bf16 %v1910_v4, %v1909_v18  ;;  %v1841_v50 = vadd.f32 %v2768_v55, %v3975_v40  ;;  %v4028_v15 = vld [vmem:[%s4206_s6] ss:$0 sm:$0xff]  ;;  %v2910_v4 = vld [vmem:[%s3098_s21 + $0x8] sm:$0xff]  }
 0x305   : > { %v1832_v26 = vpop.f32.mrf.mxu1  ;;  %v2165_v55 = vunpack.c.l.bf16 %v2910_v4 }
 0x306   : > { %v1933_v12 = vpack.c.bf16 %v1908_v39, %v1907_v47  ;;  %v1833_v8 = vadd.f32 %v3975_v40, %v1832_v26  ;;  %v1913_v61 = vmax.f32 %v1841_v50, 0.0  ;;  %v2911_v47 = vld [vmem:[%s3098_s21] sm:$0xff]  }
 0x307   : > { %v2769_v32 = vpop.f32.mrf.mxu1  ;;  %v2163_v39 = vunpack.c.l.bf16 %v2911_v47 }
 0x308   : > { %v1844_v30 = vadd.f32 %v2769_v32, %v3975_v40  ;;  %2796 = vmatprep.mubr.msk.bf16.mxu0 %vm1391_vm7, %v1933_v12  ;;  %v1911_v59 = vmax.f32 %v1833_v8, 0.0  ;;  %v2166_v32 = vunpack.c.h.bf16 %v2910_v4 }
 0x309   : > { %v1835_v49 = vpop.f32.mrf.mxu1  ;;  %2797 = vmatmul.mubr.msk.bf16.gmra.mxu0 %vm1391_vm7, %v1934_v10 }
 0x30a   : > { %v1836_v35 = vadd.f32 %v3975_v40, %v1835_v49  ;;  %v1914_v45 = vmax.f32 %v1844_v30, 0.0  ;;  %v2164_v30 = vunpack.c.h.bf16 %v2911_v47 }
 0x30b   : > { %v2772_v1 = vpop.f32.mrf.mxu1 }
 0x30c   : > { %v1912_v14 = vmax.f32 %v1836_v35, 0.0  ;;  %v1936_v0 = vpack.c.bf16 %v1914_v45, %v1913_v61  ;;  %v1857_v27 = vadd.f32 %v2772_v1, %v3975_v40 }
 0x30d   : > { %v1848_v62 = vpop.f32.mrf.mxu1 }
 0x30e   : > { %v1935_v21 = vpack.c.bf16 %v1912_v14, %v1911_v59  ;;  %v1849_v16 = vadd.f32 %v3975_v40, %v1848_v62  ;;  %v1917_v31 = vmax.f32 %v1857_v27, 0.0  ;;  %v2912_v27 = vld [vmem:[%s3098_s21 + $0x18] sm:$0xff]  }
 0x30f   : > { %v2773_v28 = vpop.f32.mrf.mxu1 }
 0x310   : > { %v1860_v29 = vadd.f32 %v2773_v28, %v3975_v40  ;;  %2800 = vmatprep.mubr.msk.bf16.mxu0 %vm1391_vm7, %v1935_v21  ;;  %v1915_v9 = vmax.f32 %v1849_v16, 0.0 }
 0x311   : > { %v1851_v54 = vpop.f32.mrf.mxu1  ;;  %2801 = vmatmul.mubr.msk.bf16.gmra.mxu0 %vm1391_vm7, %v1936_v0 }
 0x312   : > { %v1852_v63 = vadd.f32 %v3975_v40, %v1851_v54  ;;  %v1918_v25 = vmax.f32 %v1860_v29, 0.0  ;;  %v2169_v54 = vunpack.c.l.bf16 %v2912_v27 }
 0x313   : > { %v2776_v7 = vpop.f32.mrf.mxu1 }
 0x314   : > { %v1916_v52 = vmax.f32 %v1852_v63, 0.0  ;;  %v1938_v51 = vpack.c.bf16 %v1918_v25, %v1917_v31  ;;  %v1873_v58 = vadd.f32 %v2776_v7, %v3975_v40  ;;  %v2913_v7 = vld [vmem:[%s3098_s21 + $0x10] sm:$0xff]  }
 0x315   : > { %v1864_v37 = vpop.f32.mrf.mxu1 }
 0x316   : > { %v1937_v5 = vpack.c.bf16 %v1916_v52, %v1915_v9  ;;  %v1865_v53 = vadd.f32 %v3975_v40, %v1864_v37  ;;  %v1921_v19 = vmax.f32 %v1873_v58, 0.0  ;;  %v2167_v9 = vunpack.c.l.bf16 %v2913_v7 }
 0x317   : > { %v2777_v44 = vpop.f32.mrf.mxu1  ;;  %v2168_v58 = vunpack.c.h.bf16 %v2913_v7 }
 0x318   : > { %v1876_v48 = vadd.f32 %v2777_v44, %v3975_v40  ;;  %2804 = vmatprep.mubr.msk.bf16.mxu0 %vm1391_vm7, %v1937_v5  ;;  %v1919_v22 = vmax.f32 %v1865_v53, 0.0  ;;  %v2170_v5 = vunpack.c.h.bf16 %v2912_v27 }
 0x319   : > { %v1867_v34 = vpop.f32.mrf.mxu1  ;;  %2805 = vmatmul.mubr.msk.bf16.gmra.mxu0 %vm1391_vm7, %v1938_v51 }
 0x31a   : > { %v1868_v41 = vadd.f32 %v3975_v40, %v1867_v34  ;;  %v1922_v36 = vmax.f32 %v1876_v48, 0.0 }
 0x31b   : > { %v2780_v13 = vpop.f32.mrf.mxu1 }
 0x31c   : > { %v1920_v33 = vmax.f32 %v1868_v41, 0.0  ;;  %v1940_v11 = vpack.c.bf16 %v1922_v36, %v1921_v19  ;;  %v1889_v42 = vadd.f32 %v2780_v13, %v3975_v40 }
 0x31d   : > { %v1880_v57 = vpop.f32.mrf.mxu1 }
 0x31e   : > { %v1939_v38 = vpack.c.bf16 %v1920_v33, %v1919_v22  ;;  %v1881_v23 = vadd.f32 %v3975_v40, %v1880_v57  ;;  %v1925_v24 = vmax.f32 %v1889_v42, 0.0 }
 0x31f   : > { %v2781_v56 = vpop.f32.mrf.mxu1 }
 0x320   : > { %v1892_v43 = vadd.f32 %v2781_v56, %v3975_v40  ;;  %2808 = vmatprep.mubr.msk.bf16.mxu0 %vm1391_vm7, %v1939_v38  ;;  %v1923_v60 = vmax.f32 %v1881_v23, 0.0  ;;  %v2914_v23 = vld [vmem:[%s3098_s21 + $0x28] sm:$0xff]  }
 0x321   : > { %v1883_v20 = vpop.f32.mrf.mxu1  ;;  %2809 = vmatmul.mubr.msk.bf16.gmra.mxu0 %vm1391_vm7, %v1940_v11 }
 0x322   : > { %v1884_v6 = vadd.f32 %v3975_v40, %v1883_v20  ;;  %v1926_v17 = vmax.f32 %v1892_v43, 0.0  ;;  %v2173_v43 = vunpack.c.l.bf16 %v2914_v23 }
 0x324   : > { %v1924_v2 = vmax.f32 %v1884_v6, 0.0  ;;  %v1942_v3 = vpack.c.bf16 %v1926_v17, %v1925_v24  ;;  %v2915_v6 = vld [vmem:[%s3098_s21 + $0x20] sm:$0xff]  }
 0x325   : > { %v2171_v17 = vunpack.c.l.bf16 %v2915_v6  ;;  %v2172_v47 = vunpack.c.h.bf16 %v2915_v6 }
 0x326   : > { %v1941_v46 = vpack.c.bf16 %v1924_v2, %v1923_v60 }
 0x328   : > { %2812 = vmatprep.mubr.msk.bf16.mxu0 %vm1391_vm7, %v1941_v46  ;;  %v2174_v46 = vunpack.c.h.bf16 %v2914_v23 }
 0x329   : > { %2813 = vmatmul.mubr.msk.bf16.gmra.mxu0 %vm1391_vm7, %v1942_v3 }
 0x35d   : > { %v2786_v40 = vpop.f32.mrf.mxu0 }
 0x35e   : > { %v2045_v18 = vadd.f32 %v2786_v40, %v4028_v15 }
 0x35f   : > { %v2036_v26 = vpop.f32.mrf.mxu0 }
 0x360   : > { %v2197_v12 = vadd.f32 %v2165_v55, %v2045_v18  ;;  %v2037_v10 = vadd.f32 %v4028_v15, %v2036_v26 }
 0x361   : > { %v2787_v8 = vpop.f32.mrf.mxu0 }
 0x362   : > { %v2229_v50 = vmax.f32 %v2197_v12, 0.0  ;;  %v2195_v49 = vadd.f32 %v2163_v39, %v2037_v10  ;;  %v2048_v35 = vadd.f32 %v2787_v8, %v4028_v15 }
 0x363   : > { %v2039_v45 = vpop.f32.mrf.mxu0 }
 0x364   : > { %v2617_v1 = vpack.c.bf16 %v2229_v50, %v2229_v50  ;;  %v2227_v59 = vmax.f32 %v2195_v49, 0.0  ;;  %v2198_v14 = vadd.f32 %v2166_v32, %v2048_v35  ;;  %v2040_v61 = vadd.f32 %v4028_v15, %v2039_v45  ;;  %v2916_v35 = vld [vmem:[%s3098_s21 + $0x38] sm:$0xff]  }
 0x365   : > { %v2177_v45 = vunpack.c.l.bf16 %v2916_v35 }
 0x366   : > { %2390 = vst.msk [vmem:[%s4039_s19 + $0x8] sm:$0xf] %vm2387_vm15, %v2617_v1  ;;  %v2615_v62 = vpack.c.bf16 %v2227_v59, %v2227_v59  ;;  %v2230_v21 = vmax.f32 %v2198_v14, 0.0  ;;  %v2196_v0 = vadd.f32 %v2164_v30, %v2040_v61  ;;  %v2917_v61 = vld [vmem:[%s3098_s21 + $0x30] sm:$0xff]  }
 0x368   : > { %2388 = vst.msk [vmem:[%s4039_s19] sm:$0xf] %vm2387_vm15, %v2615_v62  ;;  %v2618_v28 = vpack.c.bf16 %v2230_v21, %v2230_v21  ;;  %v2228_v16 = vmax.f32 %v2196_v0, 0.0  ;;  %v2175_v62 = vunpack.c.l.bf16 %v2917_v61 }
 0x36a   : > { %2391 = vst.msk [vmem:[%s4039_s19 + $0xc] sm:$0xf] %vm2387_vm15, %v2618_v28  ;;  %v2616_v29 = vpack.c.bf16 %v2228_v16, %v2228_v16  ;;  %v2178_v16 = vunpack.c.h.bf16 %v2916_v35 }
 0x36c   : > { %2389 = vst.msk [vmem:[%s4039_s19 + $0x4] sm:$0xf] %vm2387_vm15, %v2616_v29 }
 0x395   : > { %v2790_v63 = vpop.f32.mrf.mxu0 }
 0x396   : > { %v2061_v25 = vadd.f32 %v2790_v63, %v4028_v15 }
 0x397   : > { %v2052_v52 = vpop.f32.mrf.mxu0 }
 0x398   : > { %v2201_v31 = vadd.f32 %v2169_v54, %v2061_v25  ;;  %v2053_v37 = vadd.f32 %v4028_v15, %v2052_v52  ;;  %v2176_v25 = vunpack.c.h.bf16 %v2917_v61 }
 0x399   : > { %v2791_v51 = vpop.f32.mrf.mxu0 }
 0x39a   : > { %v2233_v44 = vmax.f32 %v2201_v31, 0.0  ;;  %v2199_v53 = vadd.f32 %v2167_v9, %v2053_v37  ;;  %v2064_v48 = vadd.f32 %v2791_v51, %v4028_v15  ;;  %v2918_v9 = vld [vmem:[%s3098_s21 + $0x48] sm:$0xff]  }
 0x39b   : > { %v2055_v34 = vpop.f32.mrf.mxu0  ;;  %v2181_v52 = vunpack.c.l.bf16 %v2918_v9 }
 0x39c   : > { %v2621_v41 = vpack.c.bf16 %v2233_v44, %v2233_v44  ;;  %v2231_v36 = vmax.f32 %v2199_v53, 0.0  ;;  %v2202_v13 = vadd.f32 %v2170_v5, %v2064_v48  ;;  %v2056_v22 = vadd.f32 %v4028_v15, %v2055_v34  ;;  %v2919_v44 = vld [vmem:[%s3098_s21 + $0x40] sm:$0xff]  }
 0x39d   : > { %v2179_v53 = vunpack.c.l.bf16 %v2919_v44 }
 0x39e   : > { %2394 = vst.msk [vmem:[%s4039_s19 + $0x18] sm:$0xf] %vm2387_vm15, %v2621_v41  ;;  %v2619_v33 = vpack.c.bf16 %v2231_v36, %v2231_v36  ;;  %v2234_v19 = vmax.f32 %v2202_v13, 0.0  ;;  %v2200_v57 = vadd.f32 %v2168_v58, %v2056_v22  ;;  %v2182_v22 = vunpack.c.h.bf16 %v2918_v9 }
 0x3a0   : > { %2392 = vst.msk [vmem:[%s4039_s19 + $0x10] sm:$0xf] %vm2387_vm15, %v2619_v33  ;;  %v2622_v38 = vpack.c.bf16 %v2234_v19, %v2234_v19  ;;  %v2232_v11 = vmax.f32 %v2200_v57, 0.0 }
 0x3a2   : > { %2395 = vst.msk [vmem:[%s4039_s19 + $0x1c] sm:$0xf] %vm2387_vm15, %v2622_v38  ;;  %v2620_v56 = vpack.c.bf16 %v2232_v11, %v2232_v11  ;;  %v2180_v11 = vunpack.c.h.bf16 %v2919_v44 }
 0x3a4   : > { %2393 = vst.msk [vmem:[%s4039_s19 + $0x14] sm:$0xf] %vm2387_vm15, %v2620_v56 }
 0x3bd   : > { %v2794_v42 = vpop.f32.mrf.mxu0 }
 0x3be   : > { %v2077_v20 = vadd.f32 %v2794_v42, %v4028_v15 }
 0x3bf   : > { %v2068_v60 = vpop.f32.mrf.mxu0 }
 0x3c0   : > { %v2205_v2 = vadd.f32 %v2173_v43, %v2077_v20  ;;  %v2069_v24 = vadd.f32 %v4028_v15, %v2068_v60 }
 0x3c1   : > { %v2795_v3 = vpop.f32.mrf.mxu0 }
 0x3c2   : > { %v2237_v4 = vmax.f32 %v2205_v2, 0.0  ;;  %v2203_v55 = vadd.f32 %v2171_v17, %v2069_v24  ;;  %v2080_v40 = vadd.f32 %v2795_v3, %v4028_v15  ;;  %v2920_v17 = vld [vmem:[%s3098_s21 + $0x58] sm:$0xff]  }
 0x3c3   : > { %v2071_v39 = vpop.f32.mrf.mxu0  ;;  %v2185_v60 = vunpack.c.l.bf16 %v2920_v17 }
 0x3c4   : > { %v2625_v18 = vpack.c.bf16 %v2237_v4, %v2237_v4  ;;  %v2235_v26 = vmax.f32 %v2203_v55, 0.0  ;;  %v2206_v12 = vadd.f32 %v2174_v46, %v2080_v40  ;;  %v2072_v10 = vadd.f32 %v4028_v15, %v2071_v39  ;;  %v2921_v55 = vld [vmem:[%s3098_s21 + $0x50] sm:$0xff]  }
 0x3c5   : > { %v2183_v40 = vunpack.c.l.bf16 %v2921_v55  ;;  %v2184_v35 = vunpack.c.h.bf16 %v2921_v55 }
 0x3c6   : > { %2398 = vst.msk [vmem:[%s4039_s19 + $0x28] sm:$0xf] %vm2387_vm15, %v2625_v18  ;;  %v2623_v32 = vpack.c.bf16 %v2235_v26, %v2235_v26  ;;  %v2238_v8 = vmax.f32 %v2206_v12, 0.0  ;;  %v2204_v30 = vadd.f32 %v2172_v47, %v2072_v10  ;;  %v2186_v10 = vunpack.c.h.bf16 %v2920_v17 }
 0x3c8   : > { %2396 = vst.msk [vmem:[%s4039_s19 + $0x20] sm:$0xf] %vm2387_vm15, %v2623_v32  ;;  %v2626_v50 = vpack.c.bf16 %v2238_v8, %v2238_v8  ;;  %v2236_v49 = vmax.f32 %v2204_v30, 0.0 }
 0x3c9   : > { %v2798_v1 = vpop.f32.mrf.mxu0 }
 0x3ca   : > { %2399 = vst.msk [vmem:[%s4039_s19 + $0x2c] sm:$0xf] %vm2387_vm15, %v2626_v50  ;;  %v2624_v59 = vpack.c.bf16 %v2236_v49, %v2236_v49  ;;  %v2093_v14 = vadd.f32 %v2798_v1, %v4028_v15 }
 0x3cb   : > { %v2084_v21 = vpop.f32.mrf.mxu0 }
 0x3cc   : > { %2397 = vst.msk [vmem:[%s4039_s19 + $0x24] sm:$0xf] %vm2387_vm15, %v2624_v59  ;;  %v2209_v0 = vadd.f32 %v2177_v45, %v2093_v14  ;;  %v2085_v28 = vadd.f32 %v4028_v15, %v2084_v21 }
 0x3cd   : > { %v2799_v29 = vpop.f32.mrf.mxu0 }
 0x3ce   : > { %v2241_v27 = vmax.f32 %v2209_v0, 0.0  ;;  %v2207_v54 = vadd.f32 %v2175_v62, %v2085_v28  ;;  %v2096_v63 = vadd.f32 %v2799_v29, %v4028_v15  ;;  %v2922_v62 = vld [vmem:[%s3098_s21 + $0x68] sm:$0xff]  }
 0x3cf   : > { %v2087_v7 = vpop.f32.mrf.mxu0  ;;  %v2189_v21 = vunpack.c.l.bf16 %v2922_v62 }
 0x3d0   : > { %v2629_v31 = vpack.c.bf16 %v2241_v27, %v2241_v27  ;;  %v2239_v37 = vmax.f32 %v2207_v54, 0.0  ;;  %v2210_v5 = vadd.f32 %v2178_v16, %v2096_v63  ;;  %v2088_v51 = vadd.f32 %v4028_v15, %v2087_v7  ;;  %v2923_v54 = vld [vmem:[%s3098_s21 + $0x60] sm:$0xff]  }
 0x3d1   : > { %v2802_v48 = vpop.f32.mrf.mxu0  ;;  %v2187_v63 = vunpack.c.l.bf16 %v2923_v54 }
 0x3d2   : > { %2402 = vst.msk [vmem:[%s4039_s19 + $0x38] sm:$0xf] %vm2387_vm15, %v2629_v31  ;;  %v2627_v58 = vpack.c.bf16 %v2239_v37, %v2239_v37  ;;  %v2242_v34 = vmax.f32 %v2210_v5, 0.0  ;;  %v2208_v41 = vadd.f32 %v2176_v25, %v2088_v51  ;;  %v2109_v36 = vadd.f32 %v2802_v48, %v4028_v15 }
 0x3d3   : > { %v2100_v13 = vpop.f32.mrf.mxu0  ;;  %v2190_v37 = vunpack.c.h.bf16 %v2922_v62 }
 0x3d4   : > { %2400 = vst.msk [vmem:[%s4039_s19 + $0x30] sm:$0xf] %vm2387_vm15, %v2627_v58  ;;  %v2630_v33 = vpack.c.bf16 %v2242_v34, %v2242_v34  ;;  %v2240_v19 = vmax.f32 %v2208_v41, 0.0  ;;  %v2213_v57 = vadd.f32 %v2181_v52, %v2109_v36  ;;  %v2101_v38 = vadd.f32 %v4028_v15, %v2100_v13 }
 0x3d5   : > { %v2803_v56 = vpop.f32.mrf.mxu0  ;;  %v2188_v58 = vunpack.c.h.bf16 %v2923_v54 }
 0x3d6   : > { %2403 = vst.msk [vmem:[%s4039_s19 + $0x3c] sm:$0xf] %vm2387_vm15, %v2630_v33  ;;  %v2628_v23 = vpack.c.bf16 %v2240_v19, %v2240_v19  ;;  %v2245_v43 = vmax.f32 %v2213_v57, 0.0  ;;  %v2211_v42 = vadd.f32 %v2179_v53, %v2101_v38  ;;  %v2112_v20 = vadd.f32 %v2803_v56, %v4028_v15  ;;  %v2924_v33 = vld [vmem:[%s3098_s21 + $0x78] sm:$0xff]  }
 0x3d7   : > { %v2103_v6 = vpop.f32.mrf.mxu0  ;;  %v2193_v19 = vunpack.c.l.bf16 %v2924_v33 }
 0x3d8   : > { %2401 = vst.msk [vmem:[%s4039_s19 + $0x34] sm:$0xf] %vm2387_vm15, %v2628_v23  ;;  %v2633_v2 = vpack.c.bf16 %v2245_v43, %v2245_v43  ;;  %v2243_v24 = vmax.f32 %v2211_v42, 0.0  ;;  %v2214_v46 = vadd.f32 %v2182_v22, %v2112_v20  ;;  %v2104_v3 = vadd.f32 %v4028_v15, %v2103_v6  ;;  %v2925_v43 = vld [vmem:[%s3098_s21 + $0x70] sm:$0xff]   ;;  %s2647_s21 = sshll.u32 %s3060_s28, 11  ;;  %s4158_s28 = scalar_lea.sflag [#allocation3], %s269_s17 }
 0x3d9   : > { %v2806_v4 = vpop.f32.mrf.mxu0  ;;  %v2191_v42 = vunpack.c.l.bf16 %v2925_v43  ;;  %s4148_s22 = scalar_lea.hbm %s4207_s7, %s2647_s21 }
 0x3da   : > { %2406 = vst.msk [vmem:[%s4039_s19 + $0x48] sm:$0xf] %vm2387_vm15, %v2633_v2  ;;  %v2631_v47 = vpack.c.bf16 %v2243_v24, %v2243_v24  ;;  %v2246_v39 = vmax.f32 %v2214_v46, 0.0  ;;  %v2212_v18 = vadd.f32 %v2180_v11, %v2104_v3  ;;  %v2125_v26 = vadd.f32 %v2806_v4, %v4028_v15 }
 0x3db   : > { %v2116_v12 = vpop.f32.mrf.mxu0  ;;  %v2194_v24 = vunpack.c.h.bf16 %v2924_v33 }
 0x3dc   : > { %2404 = vst.msk [vmem:[%s4039_s19 + $0x40] sm:$0xf] %vm2387_vm15, %v2631_v47  ;;  %v2634_v32 = vpack.c.bf16 %v2246_v39, %v2246_v39  ;;  %v2244_v8 = vmax.f32 %v2212_v18, 0.0  ;;  %v2217_v30 = vadd.f32 %v2185_v60, %v2125_v26  ;;  %v2117_v50 = vadd.f32 %v4028_v15, %v2116_v12 }
 0x3dd   : > { %v2807_v49 = vpop.f32.mrf.mxu0  ;;  %v2192_v47 = vunpack.c.h.bf16 %v2925_v43 }
 0x3de   : > { %2407 = vst.msk [vmem:[%s4039_s19 + $0x4c] sm:$0xf] %vm2387_vm15, %v2634_v32  ;;  %v2632_v45 = vpack.c.bf16 %v2244_v8, %v2244_v8  ;;  %v2249_v1 = vmax.f32 %v2217_v30, 0.0  ;;  %v2215_v59 = vadd.f32 %v2183_v40, %v2117_v50  ;;  %v2128_v14 = vadd.f32 %v2807_v49, %v4028_v15 }
 0x3df   : > { %v2119_v61 = vpop.f32.mrf.mxu0 }
 0x3e0   : > { %2405 = vst.msk [vmem:[%s4039_s19 + $0x44] sm:$0xf] %vm2387_vm15, %v2632_v45  ;;  %v2637_v0 = vpack.c.bf16 %v2249_v1, %v2249_v1  ;;  %v2247_v28 = vmax.f32 %v2215_v59, 0.0  ;;  %v2218_v16 = vadd.f32 %v2186_v10, %v2128_v14  ;;  %v2120_v29 = vadd.f32 %v4028_v15, %v2119_v61 }
 0x3e1   : > { %v2810_v27 = vpop.f32.mrf.mxu0 }
 0x3e2   : > { %2410 = vst.msk [vmem:[%s4039_s19 + $0x58] sm:$0xf] %vm2387_vm15, %v2637_v0  ;;  %v2635_v25 = vpack.c.bf16 %v2247_v28, %v2247_v28  ;;  %v2250_v7 = vmax.f32 %v2218_v16, 0.0  ;;  %v2216_v9 = vadd.f32 %v2184_v35, %v2120_v29  ;;  %v2141_v52 = vadd.f32 %v2810_v27, %v4028_v15 }
 0x3e3   : > { %v2132_v31 = vpop.f32.mrf.mxu0 }
 0x3e4   : > { %2408 = vst.msk [vmem:[%s4039_s19 + $0x50] sm:$0xf] %vm2387_vm15, %v2635_v25  ;;  %v2638_v5 = vpack.c.bf16 %v2250_v7, %v2250_v7  ;;  %v2248_v51 = vmax.f32 %v2216_v9, 0.0  ;;  %v2221_v44 = vadd.f32 %v2189_v21, %v2141_v52  ;;  %v2133_v53 = vadd.f32 %v4028_v15, %v2132_v31 }
 0x3e5   : > { %v2811_v48 = vpop.f32.mrf.mxu0 }
 0x3e6   : > { %2411 = vst.msk [vmem:[%s4039_s19 + $0x5c] sm:$0xf] %vm2387_vm15, %v2638_v5  ;;  %v2636_v34 = vpack.c.bf16 %v2248_v51, %v2248_v51  ;;  %v2253_v41 = vmax.f32 %v2221_v44, 0.0  ;;  %v2219_v36 = vadd.f32 %v2187_v63, %v2133_v53  ;;  %v2144_v13 = vadd.f32 %v2811_v48, %v4028_v15 }
 0x3e7   : > { %v2135_v22 = vpop.f32.mrf.mxu0 }
 0x3e8   : > { %2409 = vst.msk [vmem:[%s4039_s19 + $0x54] sm:$0xf] %vm2387_vm15, %v2636_v34  ;;  %v2641_v57 = vpack.c.bf16 %v2253_v41, %v2253_v41  ;;  %v2251_v38 = vmax.f32 %v2219_v36, 0.0  ;;  %v2222_v11 = vadd.f32 %v2190_v37, %v2144_v13  ;;  %v2136_v56 = vadd.f32 %v4028_v15, %v2135_v22 }
 0x3e9   : > { %v2814_v23 = vpop.f32.mrf.mxu0 }
 0x3ea   : > { %2414 = vst.msk [vmem:[%s4039_s19 + $0x68] sm:$0xf] %vm2387_vm15, %v2641_v57  ;;  %v2639_v20 = vpack.c.bf16 %v2251_v38, %v2251_v38  ;;  %v2254_v6 = vmax.f32 %v2222_v11, 0.0  ;;  %v2220_v17 = vadd.f32 %v2188_v58, %v2136_v56  ;;  %v2157_v60 = vadd.f32 %v2814_v23, %v4028_v15 }
 0x3eb   : > { %v2148_v2 = vpop.f32.mrf.mxu0 }
 0x3ec   : > { %2412 = vst.msk [vmem:[%s4039_s19 + $0x60] sm:$0xf] %vm2387_vm15, %v2639_v20  ;;  %v2642_v46 = vpack.c.bf16 %v2254_v6, %v2254_v6  ;;  %v2252_v3 = vmax.f32 %v2220_v17, 0.0  ;;  %v2225_v4 = vadd.f32 %v2193_v19, %v2157_v60  ;;  %v2149_v55 = vadd.f32 %v4028_v15, %v2148_v2 }
 0x3ed   : > { %v2815_v40 = vpop.f32.mrf.mxu0 }
 0x3ee   : > { %2415 = vst.msk [vmem:[%s4039_s19 + $0x6c] sm:$0xf] %vm2387_vm15, %v2642_v46  ;;  %v2640_v39 = vpack.c.bf16 %v2252_v3, %v2252_v3  ;;  %v2257_v18 = vmax.f32 %v2225_v4, 0.0  ;;  %v2223_v26 = vadd.f32 %v2191_v42, %v2149_v55  ;;  %v2160_v12 = vadd.f32 %v2815_v40, %v4028_v15 }
 0x3ef   : > { %v2151_v10 = vpop.f32.mrf.mxu0 }
 0x3f0   : > { %2413 = vst.msk [vmem:[%s4039_s19 + $0x64] sm:$0xf] %vm2387_vm15, %v2640_v39  ;;  %v2645_v32 = vpack.c.bf16 %v2257_v18, %v2257_v18  ;;  %v2255_v8 = vmax.f32 %v2223_v26, 0.0  ;;  %v2226_v30 = vadd.f32 %v2194_v24, %v2160_v12  ;;  %v2152_v50 = vadd.f32 %v4028_v15, %v2151_v10 }
 0x3f2   : > { %2418 = vst.msk [vmem:[%s4039_s19 + $0x78] sm:$0xf] %vm2387_vm15, %v2645_v32  ;;  %v2643_v49 = vpack.c.bf16 %v2255_v8, %v2255_v8  ;;  %v2258_v35 = vmax.f32 %v2226_v30, 0.0  ;;  %v2224_v45 = vadd.f32 %v2192_v47, %v2152_v50 }
 0x3f4   : > { %2416 = vst.msk [vmem:[%s4039_s19 + $0x70] sm:$0xf] %vm2387_vm15, %v2643_v49  ;;  %v2646_v1 = vpack.c.bf16 %v2258_v35, %v2258_v35  ;;  %v2256_v59 = vmax.f32 %v2224_v45, 0.0 }
 0x3f6   : > { %2419 = vst.msk [vmem:[%s4039_s19 + $0x7c] sm:$0xf] %vm2387_vm15, %v2646_v1  ;;  %v2644_v15 = vpack.c.bf16 %v2256_v59, %v2256_v59 }
 0x3f8   : > { %2417 = vst.msk [vmem:[%s4039_s19 + $0x74] sm:$0xf] %vm2387_vm15, %v2644_v15 }
 0x3f9   : > { %2939 = shalt.err (!%p2936_p3)
}
 0x3fa   : > { %s2940_s16 = scalar_lea.hbm %s4148_s22, 2048  ;;  %s2944_s19 = scalar_lea.hbm %s4207_s7, 4096 }
 0x3fb   : > { %p2941_p4 = scmp.ne.s32.totalorder %s4148_s22, %s2940_s16  ;;  %p2945_p9 = scmp.lt.s32.totalorder %s4148_s22, %s4207_s7 }
 0x3fc   : > { %p2946_p10 = scmp.lt.s32.totalorder %s2944_s19, %s2940_s16 }
 0x3fd   : > { %p2942_p7 = pnand %p2941_p4, %p3077_p5 }
 0x3fe   : > { %p2947_p11 = por %p2946_p10, %p2945_p9 }
 0x3ff   : > { %p2943_p8 = pneg %p2942_p7 }
 0x401   : > { %p2948_p12 = pnand %p2947_p11, %p2943_p8 }
 0x403   : > { %2951 = shalt.err (!%p2948_p12)
}
 0x404   : > { %s2998_s8 = smov 4  }
 0x405   : > { %2822 = dma.vmem_to_hbm [thread:$0]  (%p3077_p5), %s4152_s20, 2048, %s4148_s22, %s4158_s28, %s2994_s15, %s2994_s15, %s2998_s8  }
 0x406 PF: > { %p2828_p13 = scmp.ge.s32.totalorder %s2986_s27, 2  ;;  %s2449_s23 = sand.u32 1, %s2974_s24  }
 0x407   : > { %s2450_s9 = scalar_lea.sflag [#allocation3], %s2449_s23 }
 0x408   : > { %p2825_p0 = pnand %p2828_p13, %p3081_p6 }
 0x40a   : > { %p2826_p1 = pneg %p2825_p0 }
 0x40c   : > { %2969 = dma.done.wait (%p2826_p1), %s2450_s9, 2048  }
 0x40d   : > { %2971 = vsyncadd (%p2826_p1), %s2450_s9, 4294965248  ;;  %p17_p2 = scmp.ge.s32.totalorder %s3064_s30, 4   ;;  %s4227_s24 = smov %s2978_s25 }
 0x40e   : > { %s4228_s25 = smov %s2982_s26  ;;  %s4229_s26 = smov %s3075_s10 }
 0x40f   : > { %s4230_s27 = smov %s3064_s30  ;;  %19 = sbr.rel (!%p17_p2) target bundleno = 3 (0x3), region = 83 }
 0x414   :  { %2455 = vsyncpa [#allocation3], 1 }
 0x415   :  { %2457 = vsyncpa [#allocation3 + $0x1], 1 }

</bundles_post_ra>
